<compile_context>
chip_gen: v6e
topology: v6e:2x2x1
jax: 0.10.0
libtpu: 0.0.40
codegen_flags: <defaults>
</compile_context>

<pallas_src>
import functools
import math

import jax
import jax.numpy as jnp
from jax import lax
from jax.experimental import pallas as pl
from jax.experimental.pallas import tpu as pltpu

_LANE = 128
_MAX_T_CHUNK = 512


def _round_up(x, m):
    return ((x + m - 1) // m) * m


def _vmem_limit_bytes():
    """Generation-aware VMEM budget: ~75% of physical capacity.
    v5e/v6e (128 MiB) -> ~96 MiB, v7x (64 MiB) -> ~48 MiB; conservative fallback otherwise."""
    try:
        cap = int(pltpu.get_tpu_info().vmem_capacity_bytes)
    except Exception:
        cap = 64 * 1024 * 1024
    return max(16 * 1024 * 1024, (cap * 3) // 4)


def _choose_t_chunk(T, B, in_dim_max, h_pad, n_bslices, inter_bytes, vmem_limit):
    """Largest time chunk whose scan + projection-GEMM VMEM footprints fit the budget."""
    budget = int(vmem_limit * 0.85)                       # headroom for compiler scratch
    bs = B // n_bslices
    n = 2 * h_pad
    # Recurrent scan: 2x-buffered xproj-in + out blocks, single-buffered weight, hx/cx carries.
    fixed_scan = h_pad * n * 4 + 2 * bs * h_pad * 4
    per_t_scan = 2 * bs * (n + h_pad) * inter_bytes
    # Hoisted projection GEMM: 2x-buffered activation in/out blocks + 2x-buffered weight.
    fixed_proj = 2 * in_dim_max * n * 4
    per_t_proj = 2 * B * (in_dim_max * 4 + n * inter_bytes)
    tc = min((budget - fixed_scan) // max(per_t_scan, 1),
             (budget - fixed_proj) // max(per_t_proj, 1),
             _MAX_T_CHUNK)
    tc = int(max(1, tc))
    if tc >= T:
        return T
    return max(8, (tc // 8) * 8)   # keep the folded (t_chunk*B) row dim sublane-aligned


# ----------------------------------------------------------------------------
# Hoisted input-projection GEMMs (time axis folded into the row/sublane dim).
# ----------------------------------------------------------------------------
def _ln_proj_kernel(x_ref, g_ref, b_ref, w_ref, o_ref):
    """Fused pre-LayerNorm (over features) + input projection: (RC, F) @ (F, 2Hp)."""
    x = x_ref[...].astype(jnp.float32)
    mean = jnp.mean(x, axis=-1, keepdims=True)
    var = jnp.mean(jnp.square(x - mean), axis=-1, keepdims=True)
    xn = (x - mean) * lax.rsqrt(var + 1e-5)
    xn = xn * g_ref[...] + b_ref[...]
    o_ref[...] = jnp.dot(xn, w_ref[...],
                         preferred_element_type=jnp.float32).astype(o_ref.dtype)


def _proj_kernel(x_ref, w_ref, o_ref):
    """Plain input projection for layers >= 1: (RC, Hp) @ (Hp, 2Hp)."""
    o_ref[...] = jnp.dot(x_ref[...].astype(jnp.float32), w_ref[...],
                         preferred_element_type=jnp.float32).astype(o_ref.dtype)


def ln_input_proj(x2, gamma2, beta2, w_in, row_chunk, out_dtype, vmem_limit):
    R, F = x2.shape
    N = w_in.shape[1]
    return pl.pallas_call(
        _ln_proj_kernel,
        out_shape=jax.ShapeDtypeStruct((R, N), out_dtype),
        grid_spec=pltpu.PrefetchScalarGridSpec(
            num_scalar_prefetch=0,
            grid=(R // row_chunk,),
            in_specs=[
                pl.BlockSpec((row_chunk, F), lambda r: (r, 0)),
                pl.BlockSpec((1, F), lambda r: (0, 0)),
                pl.BlockSpec((1, F), lambda r: (0, 0)),
                # TODO(synk): pipeline_mode=pl.Buffered(1) on this constant-index weight spec
                # would reclaim its second (useless) pipeline buffer; kept default for safety.
                pl.BlockSpec((F, N), lambda r: (0, 0)),
            ],
            out_specs=pl.BlockSpec((row_chunk, N), lambda r: (r, 0)),
        ),
        compiler_params=pltpu.CompilerParams(
            dimension_semantics=("parallel",),       # shards rows across TCs on v7x megacore
            vmem_limit_bytes=vmem_limit),
    )(x2, gamma2, beta2, w_in)


def input_proj(x2, w_in, row_chunk, out_dtype, vmem_limit):
    R, K = x2.shape
    N = w_in.shape[1]
    return pl.pallas_call(
        _proj_kernel,
        out_shape=jax.ShapeDtypeStruct((R, N), out_dtype),
        grid_spec=pltpu.PrefetchScalarGridSpec(
            num_scalar_prefetch=0,
            grid=(R // row_chunk,),
            in_specs=[
                pl.BlockSpec((row_chunk, K), lambda r: (r, 0)),
                pl.BlockSpec((K, N), lambda r: (0, 0)),
            ],
            out_specs=pl.BlockSpec((row_chunk, N), lambda r: (r, 0)),
        ),
        compiler_params=pltpu.CompilerParams(
            dimension_semantics=("parallel",),
            vmem_limit_bytes=vmem_limit),
    )(x2, w_in)


# ----------------------------------------------------------------------------
# Recurrent GSU scan: grid = (batch_slices, time_chunks); hx/cx and the single-buffered
# fused recurrent weight live in VMEM scratch; manual 2x-unrolled fori_loop over timesteps.
# ----------------------------------------------------------------------------
def _gsu_scan_kernel(xproj_ref, wrec_hbm, out_ref, w_sc, hx_sc, cx_sc, *,
                     hidden, t_chunk):
    @pl.when(pl.program_id(1) == 0)
    def _():
        # Single-buffered recurrent weight: DMA'd from HBM once per batch slice (the time
        # axis is sequential, so chunk 0 of each slice runs before its other chunks).
        pltpu.sync_copy(wrec_hbm, w_sc)
        hx_sc[...] = jnp.zeros_like(hx_sc)   # MemoryState hx = zeros
        cx_sc[...] = jnp.zeros_like(cx_sc)   # MemoryState cx = zeros

    def step(tl):
        gx = xproj_ref[tl].astype(jnp.float32)                # (Bs, 2Hp) hoisted x-projection
        # TODO(synk): hold w_sc in the MXU weight-staging registers across the loop
        # (pltpu.matmul_push_rhs / matmul_acc_lhs / matmul_pop) instead of re-pushing per step.
        gates = gx + jnp.dot(hx_sc[...], w_sc[...],
                             preferred_element_type=jnp.float32)
        i_t = gates[:, :hidden]                               # lane-tile aligned split (Hp%128==0)
        z = gates[:, hidden:]
        # sigmoid via EUP exp + approximate EUP reciprocal (divide leaves the VALU slot).
        beta = pl.reciprocal(1.0 + jnp.exp(-z), approx=True)
        cy = i_t + beta * (cx_sc[...] - i_t)                  # == beta*cx + (1-beta)*i_t
        hy = jnp.maximum(cy, 0.0)
        cx_sc[...] = cy
        hx_sc[...] = hy
        out_ref[tl] = hy.astype(out_ref.dtype)                # lane-dense (Bs, Hp) store

    # Manual 2x unroll: two timesteps visible per loop back-edge for the LLO scheduler.
    def step2(i, carry):
        step(i * 2)
        step(i * 2 + 1)
        return carry

    lax.fori_loop(0, t_chunk // 2, step2, 0)
    if t_chunk % 2:
        step(t_chunk - 1)


def gsu_scan(xproj_tbn, w_rec, t_chunk, n_bslices, out_dtype, vmem_limit):
    """xproj_tbn: (T_pad, B, 2Hp) precomputed input gates; w_rec: (Hp, 2Hp) fused [W_hh|W_hh2]^T."""
    T_pad, B, N = xproj_tbn.shape
    Hp = N // 2
    Bs = B // n_bslices
    kernel = functools.partial(_gsu_scan_kernel, hidden=Hp, t_chunk=t_chunk)
    return pl.pallas_call(
        kernel,
        out_shape=jax.ShapeDtypeStruct((T_pad, B, Hp), out_dtype),
        grid_spec=pltpu.PrefetchScalarGridSpec(
            num_scalar_prefetch=0,
            grid=(n_bslices, T_pad // t_chunk),
            in_specs=[
                pl.BlockSpec((t_chunk, Bs, N), lambda b, c: (c, b, 0)),
                pl.BlockSpec(memory_space=pl.ANY),   # recurrent weight stays in HBM (raw ref)
            ],
            out_specs=pl.BlockSpec((t_chunk, Bs, Hp), lambda b, c: (c, b, 0)),
            scratch_shapes=[
                pltpu.VMEM((Hp, N), jnp.float32),    # single-buffered fused recurrent weight
                pltpu.VMEM((Bs, Hp), jnp.float32),   # hx carry
                pltpu.VMEM((Bs, Hp), jnp.float32),   # cx carry
            ],
        ),
        compiler_params=pltpu.CompilerParams(
            # batch slices independent (shardable across v7x's 2 TCs); time chunks sequential.
            dimension_semantics=("parallel", "arbitrary"),
            vmem_limit_bytes=vmem_limit),
    )(xproj_tbn, w_rec)


# ----------------------------------------------------------------------------
# Parameter construction: PyTorch-style uniform(-stdv, stdv), pre-transposed, gate-fused,
# and zero-padded so the hidden (lane) dimension is a multiple of 128.
# ----------------------------------------------------------------------------
def init_params(key, input_size, hidden_size, num_layers):
    H = hidden_size
    Hp = _round_up(H, _LANE)
    params = {
        "ln_gamma": jnp.ones((input_size,), jnp.float32),   # nn.LayerNorm defaults
        "ln_beta": jnp.zeros((input_size,), jnp.float32),
        "layers": [],
    }
    stdv = 1.0 / math.sqrt(hidden_size)

    def pad2(w, rows, cols):
        return jnp.pad(w, ((0, rows - w.shape[0]), (0, cols - w.shape[1])))

    for l in range(num_layers):
        in_dim = input_size if l == 0 else hidden_size
        in_pad = input_size if l == 0 else Hp
        keys = jax.random.split(jax.random.fold_in(key, l), 4)
        w_ih = jax.random.uniform(keys[0], (H, in_dim), jnp.float32, -stdv, stdv)
        w_hh = jax.random.uniform(keys[1], (H, H), jnp.float32, -stdv, stdv)
        w_ih2 = jax.random.uniform(keys[2], (H, in_dim), jnp.float32, -stdv, stdv)
        w_hh2 = jax.random.uniform(keys[3], (H, H), jnp.float32, -stdv, stdv)
        params["layers"].append({
            "w_in": jnp.concatenate([pad2(w_ih.T, in_pad, Hp),
                                     pad2(w_ih2.T, in_pad, Hp)], axis=1),   # (in_pad, 2Hp)
            "w_rec": jnp.concatenate([pad2(w_hh.T, Hp, Hp),
                                      pad2(w_hh2.T, Hp, Hp)], axis=1),      # (Hp, 2Hp)
        })
    return params


# ----------------------------------------------------------------------------
# Full SequenceModel forward (proj = Identity, output activation = Identity).
# ----------------------------------------------------------------------------
def sequence_model_forward(params, x_bft, *, hidden_size, t_chunk=None,
                           num_batch_slices=None, intermediate_dtype=jnp.bfloat16):
    assert x_bft.ndim == 3, "Input tensor must be 3D."
    B, F, T = x_bft.shape
    Hp = params["layers"][0]["w_rec"].shape[0]
    H = hidden_size
    vmem_limit = _vmem_limit_bytes()

    if num_batch_slices is None:
        # Batch-parallel scan axis (v7x megacore); only when each slice keeps >= 8 sublane rows.
        num_batch_slices = 2 if (B % 16 == 0) else 1
    assert B % num_batch_slices == 0

    inter_bytes = jnp.dtype(intermediate_dtype).itemsize
    if t_chunk is None:
        t_chunk = _choose_t_chunk(T, B, max(F, Hp), Hp, num_batch_slices,
                                  inter_bytes, vmem_limit)
    t_chunk = max(1, min(t_chunk, T))
    T_pad = _round_up(T, t_chunk)
    row_chunk = t_chunk * B

    x_tbf = jnp.transpose(x_bft, (2, 0, 1)).astype(jnp.float32)      # 'b f t -> t b f'
    if T_pad != T:
        # Zero-pad the time tail; recurrence is causal so real outputs are unaffected.
        x_tbf = jnp.pad(x_tbf, ((0, T_pad - T), (0, 0), (0, 0)))
    x2 = x_tbf.reshape(T_pad * B, F)

    gamma2 = params["ln_gamma"].reshape(1, F)
    beta2 = params["ln_beta"].reshape(1, F)

    all_layer_outputs = []
    h2 = None
    for li, layer in enumerate(params["layers"]):
        if li == 0:
            xproj2 = ln_input_proj(x2, gamma2, beta2, layer["w_in"], row_chunk,
                                   intermediate_dtype, vmem_limit)
        else:
            # TODO(synk): fuse this projection into the previous scan's per-chunk epilogue
            # (second kernel output) to skip the HBM round trip of h3.
            xproj2 = input_proj(h2, layer["w_in"], row_chunk,
                                intermediate_dtype, vmem_limit)
        xproj = xproj2.reshape(T_pad, B, 2 * Hp)
        h3 = gsu_scan(xproj, layer["w_rec"], t_chunk, num_batch_slices,
                      intermediate_dtype, vmem_limit)                 # (T_pad, B, Hp)
        all_layer_outputs.append(h3[:T, :, :H].astype(jnp.float32))   # logical (T, B, H)
        h2 = h3.reshape(T_pad * B, Hp)

    output = all_layer_outputs[-1]                                    # proj = Identity
    all_layer_outputs = all_layer_outputs + [output]
    # output_activate_function = Identity
    output_bft = jnp.transpose(output, (1, 2, 0))                     # 't b f -> b f t'
    return output_bft, all_layer_outputs


# ----------------------------------------------------------------------------
# Pure-JAX reference (same math, f32 throughout, no Pallas) for correctness checks.
# ----------------------------------------------------------------------------
def _reference_forward(params, x_bft, hidden_size):
    x = jnp.transpose(x_bft, (2, 0, 1)).astype(jnp.float32)
    mean = jnp.mean(x, axis=-1, keepdims=True)
    var = jnp.mean(jnp.square(x - mean), axis=-1, keepdims=True)
    x = (x - mean) * lax.rsqrt(var + 1e-5) * params["ln_gamma"] + params["ln_beta"]

    outs = []
    h_in = x
    B = x.shape[1]
    for layer in params["layers"]:
        w_in, w_rec = layer["w_in"], layer["w_rec"]
        Hp = w_rec.shape[0]

        def step(carry, xt, w_in=w_in, w_rec=w_rec, Hp=Hp):
            hx, cx = carry
            gates = xt @ w_in + hx @ w_rec
            i_t = gates[:, :Hp]
            beta = jax.nn.sigmoid(gates[:, Hp:])
            cy = beta * cx + (1.0 - beta) * i_t
            hy = jnp.maximum(cy, 0.0)
            return (hy, cy), hy

        init = (jnp.zeros((B, Hp), jnp.float32), jnp.zeros((B, Hp), jnp.float32))
        _, h_seq = jax.lax.scan(step, init, h_in)
        outs.append(h_seq[:, :, :hidden_size])
        h_in = h_seq
    final = outs[-1]
    return jnp.transpose(final, (1, 2, 0)), outs + [final]


if __name__ == "__main__":
    # Small shapes consistent with the module: (batch, num_freqs, seq_len)
    B, F, T = 2, 16, 8
    HIDDEN, NUM_LAYERS = 32, 2

    key = jax.random.PRNGKey(0)
    pkey, xkey = jax.random.split(key)
    params = init_params(pkey, input_size=F, hidden_size=HIDDEN, num_layers=NUM_LAYERS)
    x = jax.random.normal(xkey, (B, F, T), jnp.float32)

    ref_out, ref_layers = jax.block_until_ready(_reference_forward(params, x, HIDDEN))

    # f32 intermediates: tight check (approx EUP reciprocal in sigmoid -> small deviation).
    fwd_f32 = jax.jit(functools.partial(sequence_model_forward, hidden_size=HIDDEN,
                                        intermediate_dtype=jnp.float32))
    out, layer_outs = jax.block_until_ready(fwd_f32(params, x))
    assert out.shape == (B, HIDDEN, T), out.shape
    assert len(layer_outs) == NUM_LAYERS + 1
    assert jnp.allclose(out, ref_out, atol=1e-2, rtol=1e-2), "f32 output mismatch vs reference"
    for a, b in zip(layer_outs, ref_layers):
        assert jnp.allclose(a, b, atol=1e-2, rtol=1e-2), "f32 layer output mismatch vs reference"

    # Default bf16 intermediates (production HBM-traffic path): looser tolerance.
    fwd_bf16 = jax.jit(functools.partial(sequence_model_forward, hidden_size=HIDDEN))
    out16, layer_outs16 = jax.block_until_ready(fwd_bf16(params, x))
    assert out16.shape == (B, HIDDEN, T), out16.shape
    assert jnp.allclose(out16, ref_out, atol=8e-2, rtol=8e-2), "bf16 output mismatch vs reference"

    print("KERNEL_OK")
</pallas_src>

<mosaic_0001>
module attributes {stable_mosaic.version = 11 : i64} {
  func.func @_ln_proj_kernel(%arg0: i32, %arg1: memref<16x16xf32, #tpu.memory_space<vmem>>, %arg2: memref<1x16xf32, #tpu.memory_space<vmem>>, %arg3: memref<1x16xf32, #tpu.memory_space<vmem>>, %arg4: memref<16x256xf32, #tpu.memory_space<vmem>>, %arg5: memref<16x256xf32, #tpu.memory_space<vmem>>) attributes {dimension_semantics = [#tpu.dimension_semantics<parallel>], iteration_bounds = array<i64: 1>, scalar_prefetch = 0 : i64, scratch_operands = 0 : i64, tpu.core_type = #tpu.core_type<tc>, window_params = [{transform_indices = @transform_0, window_bounds = array<i64: 16, 16>}, {pipeline_mode = #tpu.pipeline_mode<synchronous>, transform_indices = @transform_1, window_bounds = array<i64: 1, 16>}, {pipeline_mode = #tpu.pipeline_mode<synchronous>, transform_indices = @transform_2, window_bounds = array<i64: 1, 16>}, {pipeline_mode = #tpu.pipeline_mode<synchronous>, transform_indices = @transform_3, window_bounds = array<i64: 16, 256>}, {transform_indices = @transform_4, window_bounds = array<i64: 16, 256>}]} {
    %c0 = arith.constant 0 : index
    %c0_0 = arith.constant 0 : index
    %0 = vector.load %arg1[%c0, %c0_0] : memref<16x16xf32, #tpu.memory_space<vmem>>, vector<16x16xf32>
    %cst = arith.constant dense<0.000000e+00> : vector<16xf32>
    %1 = vector.multi_reduction <add>, %0, %cst [1] : vector<16x16xf32> to vector<16xf32>
    %2 = vector.shape_cast %1 : vector<16xf32> to vector<16x1xf32>
    %cst_1 = arith.constant 1.600000e+01 : f32
    %3 = vector.broadcast %cst_1 : f32 to vector<16x1xf32>
    %4 = arith.divf %2, %3 : vector<16x1xf32>
    %5 = vector.broadcast %4 : vector<16x1xf32> to vector<16x16xf32>
    %6 = arith.subf %0, %5 : vector<16x16xf32>
    %7 = arith.mulf %6, %6 : vector<16x16xf32>
    %cst_2 = arith.constant dense<0.000000e+00> : vector<16xf32>
    %8 = vector.multi_reduction <add>, %7, %cst_2 [1] : vector<16x16xf32> to vector<16xf32>
    %9 = vector.shape_cast %8 : vector<16xf32> to vector<16x1xf32>
    %cst_3 = arith.constant 1.600000e+01 : f32
    %10 = vector.broadcast %cst_3 : f32 to vector<16x1xf32>
    %11 = arith.divf %9, %10 : vector<16x1xf32>
    %12 = vector.broadcast %4 : vector<16x1xf32> to vector<16x16xf32>
    %13 = arith.subf %0, %12 : vector<16x16xf32>
    %cst_4 = arith.constant 9.99999974E-6 : f32
    %14 = vector.broadcast %cst_4 : f32 to vector<16x1xf32>
    %15 = arith.addf %11, %14 : vector<16x1xf32>
    %16 = math.rsqrt %15 : vector<16x1xf32>
    %17 = vector.broadcast %16 : vector<16x1xf32> to vector<16x16xf32>
    %18 = arith.mulf %13, %17 : vector<16x16xf32>
    %c0_5 = arith.constant 0 : index
    %c0_6 = arith.constant 0 : index
    %19 = vector.load %arg2[%c0_5, %c0_6] : memref<1x16xf32, #tpu.memory_space<vmem>>, vector<1x16xf32>
    %20 = vector.broadcast %19 : vector<1x16xf32> to vector<16x16xf32>
    %21 = arith.mulf %18, %20 : vector<16x16xf32>
    %c0_7 = arith.constant 0 : index
    %c0_8 = arith.constant 0 : index
    %22 = vector.load %arg3[%c0_7, %c0_8] : memref<1x16xf32, #tpu.memory_space<vmem>>, vector<1x16xf32>
    %23 = vector.broadcast %22 : vector<1x16xf32> to vector<16x16xf32>
    %24 = arith.addf %21, %23 : vector<16x16xf32>
    %c0_9 = arith.constant 0 : index
    %c0_10 = arith.constant 0 : index
    %25 = vector.load %arg4[%c0_9, %c0_10] : memref<16x256xf32, #tpu.memory_space<vmem>>, vector<16x256xf32>
    %cst_11 = arith.constant dense<0.000000e+00> : vector<16x256xf32>
    %26 = tpu.matmul %24, %25, %cst_11 {dimension_numbers = #tpu.dot_dimension_numbers<[1], [0], [0], [1], [0, 0, 1, 1], [], []>} : vector<16x16xf32>, vector<16x256xf32>, vector<16x256xf32> -> vector<16x256xf32>
    %c0_12 = arith.constant 0 : index
    %c0_13 = arith.constant 0 : index
    %27 = vector.load %arg5[%c0_12, %c0_13] : memref<16x256xf32, #tpu.memory_space<vmem>>, vector<16x256xf32>
    tpu.vector_store %arg5[%c0_12, %c0_13], %26 {strides = array<i32>} : memref<16x256xf32, #tpu.memory_space<vmem>>, vector<16x256xf32>,
    return
  }
  func.func @transform_0(%arg0: i32) -> (i32, i32) {
    %c0_i32 = arith.constant 0 : i32
    %c0_i32_0 = arith.constant 0 : i32
    return %arg0, %c0_i32 : i32, i32
  }
  func.func @transform_1(%arg0: i32) -> (i32, i32) {
    %c0_i32 = arith.constant 0 : i32
    %c0_i32_0 = arith.constant 0 : i32
    %c0_i32_1 = arith.constant 0 : i32
    return %c0_i32, %c0_i32_0 : i32, i32
  }
  func.func @transform_2(%arg0: i32) -> (i32, i32) {
    %c0_i32 = arith.constant 0 : i32
    %c0_i32_0 = arith.constant 0 : i32
    %c0_i32_1 = arith.constant 0 : i32
    return %c0_i32, %c0_i32_0 : i32, i32
  }
  func.func @transform_3(%arg0: i32) -> (i32, i32) {
    %c0_i32 = arith.constant 0 : i32
    %c0_i32_0 = arith.constant 0 : i32
    %c0_i32_1 = arith.constant 0 : i32
    return %c0_i32, %c0_i32_0 : i32, i32
  }
  func.func @transform_4(%arg0: i32) -> (i32, i32) {
    %c0_i32 = arith.constant 0 : i32
    %c0_i32_0 = arith.constant 0 : i32
    return %arg0, %c0_i32 : i32, i32
  }
}

module attributes {stable_mosaic.version = 11 : i64} {
  func.func @_gsu_scan_kernel(%arg0: i32, %arg1: i32, %arg2: memref<8x2x256xf32, #tpu.memory_space<vmem>>, %arg3: memref<128x256xf32, #tpu.memory_space<any>>, %arg4: memref<8x2x128xf32, #tpu.memory_space<vmem>>, %arg5: memref<128x256xf32, #tpu.memory_space<vmem>>, %arg6: memref<2x128xf32, #tpu.memory_space<vmem>>, %arg7: memref<2x128xf32, #tpu.memory_space<vmem>>) attributes {dimension_semantics = [#tpu.dimension_semantics<parallel>, #tpu.dimension_semantics<arbitrary>], iteration_bounds = array<i64: 1, 1>, scalar_prefetch = 0 : i64, scratch_operands = 3 : i64, tpu.core_type = #tpu.core_type<tc>, window_params = [{transform_indices = @transform_0, window_bounds = array<i64: 8, 2, 256>}, {}, {transform_indices = @transform_2, window_bounds = array<i64: 8, 2, 128>}]} {
    %c0_i32 = arith.constant 0 : i32
    %0 = arith.cmpi eq, %arg1, %c0_i32 : i32
    %1 = arith.extui %0 : i1 to i32
    %c0_i32_0 = arith.constant 0 : i32
    %2 = arith.cmpi ne, %1, %c0_i32_0 : i32
    scf.if %2 {
      "tpu.region"() ({
        %8 = tpu.sem_alloc : memref<!tpu.dma_semaphore, #tpu.memory_space<semaphore_mem>>
        tpu.enqueue_dma source(%arg3 : memref<128x256xf32, #tpu.memory_space<any>>) target(%arg5 : memref<128x256xf32, #tpu.memory_space<vmem>>) target_semaphore(%8 : memref<!tpu.dma_semaphore, #tpu.memory_space<semaphore_mem>>)
        tpu.wait_dma2 semaphore(%8 : memref<!tpu.dma_semaphore, #tpu.memory_space<semaphore_mem>>) src(%arg3 : memref<128x256xf32, #tpu.memory_space<any>>) dst(%arg5 : memref<128x256xf32, #tpu.memory_space<vmem>>)
        tpu.yield
      }) : () -> ()
      %cst = arith.constant 0.000000e+00 : f32
      %4 = vector.broadcast %cst : f32 to vector<2x128xf32>
      %c0 = arith.constant 0 : index
      %c0_3 = arith.constant 0 : index
      %5 = vector.load %arg6[%c0, %c0_3] : memref<2x128xf32, #tpu.memory_space<vmem>>, vector<2x128xf32>
      tpu.vector_store %arg6[%c0, %c0_3], %4 {strides = array<i32>} : memref<2x128xf32, #tpu.memory_space<vmem>>, vector<2x128xf32>,
      %cst_4 = arith.constant 0.000000e+00 : f32
      %6 = vector.broadcast %cst_4 : f32 to vector<2x128xf32>
      %c0_5 = arith.constant 0 : index
      %c0_6 = arith.constant 0 : index
      %7 = vector.load %arg7[%c0_5, %c0_6] : memref<2x128xf32, #tpu.memory_space<vmem>>, vector<2x128xf32>
      tpu.vector_store %arg7[%c0_5, %c0_6], %6 {strides = array<i32>} : memref<2x128xf32, #tpu.memory_space<vmem>>, vector<2x128xf32>,
    } else {
    }
    %c0_i32_1 = arith.constant 0 : i32
    %c4_i32 = arith.constant 4 : i32
    %3 = arith.addi %c0_i32_1, %c4_i32 : i32
    %c1_i32 = arith.constant 1 : i32
    scf.for %arg8 = %c0_i32_1 to %3 step %c1_i32  : i32 {
      %c2_i32 = arith.constant 2 : i32
      %4 = arith.muli %arg8, %c2_i32 : i32
      %5 = arith.index_cast %4 : i32 to index
      %c0 = arith.constant 0 : index
      %c0_3 = arith.constant 0 : index
      %6 = vector.load %arg2[%5, %c0, %c0_3] : memref<8x2x256xf32, #tpu.memory_space<vmem>>, vector<1x2x256xf32>
      %7 = vector.shape_cast %6 : vector<1x2x256xf32> to vector<2x256xf32>
      %c0_4 = arith.constant 0 : index
      %c0_5 = arith.constant 0 : index
      %8 = vector.load %arg6[%c0_4, %c0_5] : memref<2x128xf32, #tpu.memory_space<vmem>>, vector<2x128xf32>
      %c0_6 = arith.constant 0 : index
      %c0_7 = arith.constant 0 : index
      %9 = vector.load %arg5[%c0_6, %c0_7] : memref<128x256xf32, #tpu.memory_space<vmem>>, vector<128x256xf32>
      %cst = arith.constant dense<0.000000e+00> : vector<2x256xf32>
      %10 = tpu.matmul %8, %9, %cst {dimension_numbers = #tpu.dot_dimension_numbers<[1], [0], [0], [1], [0, 0, 1, 1], [], []>} : vector<2x128xf32>, vector<128x256xf32>, vector<2x256xf32> -> vector<2x256xf32>
      %11 = arith.addf %7, %10 : vector<2x256xf32>
      %12 = vector.extract_strided_slice %11 {offsets = [0, 0], sizes = [2, 128], strides = [1, 1]} : vector<2x256xf32> to vector<2x128xf32>
      %13 = vector.extract_strided_slice %11 {offsets = [0, 128], sizes = [2, 128], strides = [1, 1]} : vector<2x256xf32> to vector<2x128xf32>
      %cst_8 = arith.constant 0.000000e+00 : f32
      %14 = vector.broadcast %cst_8 : f32 to vector<2x128xf32>
      %15 = arith.subf %14, %13 : vector<2x128xf32>
      %16 = math.exp %15 : vector<2x128xf32>
      %cst_9 = arith.constant 1.000000e+00 : f32
      %17 = vector.broadcast %cst_9 : f32 to vector<2x128xf32>
      %18 = arith.addf %17, %16 : vector<2x128xf32>
      %19 = tpu.reciprocal %18 {approx = true} : vector<2x128xf32> -> vector<2x128xf32>
      %c0_10 = arith.constant 0 : index
      %c0_11 = arith.constant 0 : index
      %20 = vector.load %arg7[%c0_10, %c0_11] : memref<2x128xf32, #tpu.memory_space<vmem>>, vector<2x128xf32>
      %21 = arith.subf %20, %12 : vector<2x128xf32>
      %22 = arith.mulf %19, %21 : vector<2x128xf32>
      %23 = arith.addf %12, %22 : vector<2x128xf32>
      %cst_12 = arith.constant 0.000000e+00 : f32
      %24 = vector.broadcast %cst_12 : f32 to vector<2x128xf32>
      %25 = arith.maximumf %23, %24 : vector<2x128xf32>
      %c0_13 = arith.constant 0 : index
      %c0_14 = arith.constant 0 : index
      %26 = vector.load %arg7[%c0_13, %c0_14] : memref<2x128xf32, #tpu.memory_space<vmem>>, vector<2x128xf32>
      tpu.vector_store %arg7[%c0_13, %c0_14], %23 {strides = array<i32>} : memref<2x128xf32, #tpu.memory_space<vmem>>, vector<2x128xf32>,
      %c0_15 = arith.constant 0 : index
      %c0_16 = arith.constant 0 : index
      %27 = vector.load %arg6[%c0_15, %c0_16] : memref<2x128xf32, #tpu.memory_space<vmem>>, vector<2x128xf32>
      tpu.vector_store %arg6[%c0_15, %c0_16], %25 {strides = array<i32>} : memref<2x128xf32, #tpu.memory_space<vmem>>, vector<2x128xf32>,
      %28 = arith.index_cast %4 : i32 to index
      %c0_17 = arith.constant 0 : index
      %c0_18 = arith.constant 0 : index
      %29 = vector.load %arg4[%28, %c0_17, %c0_18] : memref<8x2x128xf32, #tpu.memory_space<vmem>>, vector<1x2x128xf32>
      %30 = vector.shape_cast %29 : vector<1x2x128xf32> to vector<2x128xf32>
      %31 = vector.shape_cast %25 : vector<2x128xf32> to vector<1x2x128xf32>
      tpu.vector_store %arg4[%28, %c0_17, %c0_18], %31 {strides = array<i32>} : memref<8x2x128xf32, #tpu.memory_space<vmem>>, vector<1x2x128xf32>,
      %c2_i32_19 = arith.constant 2 : i32
      %32 = arith.muli %arg8, %c2_i32_19 : i32
      %c1_i32_20 = arith.constant 1 : i32
      %33 = arith.addi %32, %c1_i32_20 : i32
      %34 = arith.index_cast %33 : i32 to index
      %c0_21 = arith.constant 0 : index
      %c0_22 = arith.constant 0 : index
      %35 = vector.load %arg2[%34, %c0_21, %c0_22] : memref<8x2x256xf32, #tpu.memory_space<vmem>>, vector<1x2x256xf32>
      %36 = vector.shape_cast %35 : vector<1x2x256xf32> to vector<2x256xf32>
      %c0_23 = arith.constant 0 : index
      %c0_24 = arith.constant 0 : index
      %37 = vector.load %arg6[%c0_23, %c0_24] : memref<2x128xf32, #tpu.memory_space<vmem>>, vector<2x128xf32>
      %c0_25 = arith.constant 0 : index
      %c0_26 = arith.constant 0 : index
      %38 = vector.load %arg5[%c0_25, %c0_26] : memref<128x256xf32, #tpu.memory_space<vmem>>, vector<128x256xf32>
      %cst_27 = arith.constant dense<0.000000e+00> : vector<2x256xf32>
      %39 = tpu.matmul %37, %38, %cst_27 {dimension_numbers = #tpu.dot_dimension_numbers<[1], [0], [0], [1], [0, 0, 1, 1], [], []>} : vector<2x128xf32>, vector<128x256xf32>, vector<2x256xf32> -> vector<2x256xf32>
      %40 = arith.addf %36, %39 : vector<2x256xf32>
      %41 = vector.extract_strided_slice %40 {offsets = [0, 0], sizes = [2, 128], strides = [1, 1]} : vector<2x256xf32> to vector<2x128xf32>
      %42 = vector.extract_strided_slice %40 {offsets = [0, 128], sizes = [2, 128], strides = [1, 1]} : vector<2x256xf32> to vector<2x128xf32>
      %cst_28 = arith.constant 0.000000e+00 : f32
      %43 = vector.broadcast %cst_28 : f32 to vector<2x128xf32>
      %44 = arith.subf %43, %42 : vector<2x128xf32>
      %45 = math.exp %44 : vector<2x128xf32>
      %cst_29 = arith.constant 1.000000e+00 : f32
      %46 = vector.broadcast %cst_29 : f32 to vector<2x128xf32>
      %47 = arith.addf %46, %45 : vector<2x128xf32>
      %48 = tpu.reciprocal %47 {approx = true} : vector<2x128xf32> -> vector<2x128xf32>
      %c0_30 = arith.constant 0 : index
      %c0_31 = arith.constant 0 : index
      %49 = vector.load %arg7[%c0_30, %c0_31] : memref<2x128xf32, #tpu.memory_space<vmem>>, vector<2x128xf32>
      %50 = arith.subf %49, %41 : vector<2x128xf32>
      %51 = arith.mulf %48, %50 : vector<2x128xf32>
      %52 = arith.addf %41, %51 : vector<2x128xf32>
      %cst_32 = arith.constant 0.000000e+00 : f32
      %53 = vector.broadcast %cst_32 : f32 to vector<2x128xf32>
      %54 = arith.maximumf %52, %53 : vector<2x128xf32>
      %c0_33 = arith.constant 0 : index
      %c0_34 = arith.constant 0 : index
      %55 = vector.load %arg7[%c0_33, %c0_34] : memref<2x128xf32, #tpu.memory_space<vmem>>, vector<2x128xf32>
      tpu.vector_store %arg7[%c0_33, %c0_34], %52 {strides = array<i32>} : memref<2x128xf32, #tpu.memory_space<vmem>>, vector<2x128xf32>,
      %c0_35 = arith.constant 0 : index
      %c0_36 = arith.constant 0 : index
      %56 = vector.load %arg6[%c0_35, %c0_36] : memref<2x128xf32, #tpu.memory_space<vmem>>, vector<2x128xf32>
      tpu.vector_store %arg6[%c0_35, %c0_36], %54 {strides = array<i32>} : memref<2x128xf32, #tpu.memory_space<vmem>>, vector<2x128xf32>,
      %57 = arith.index_cast %33 : i32 to index
      %c0_37 = arith.constant 0 : index
      %c0_38 = arith.constant 0 : index
      %58 = vector.load %arg4[%57, %c0_37, %c0_38] : memref<8x2x128xf32, #tpu.memory_space<vmem>>, vector<1x2x128xf32>
      %59 = vector.shape_cast %58 : vector<1x2x128xf32> to vector<2x128xf32>
      %60 = vector.shape_cast %54 : vector<2x128xf32> to vector<1x2x128xf32>
      tpu.vector_store %arg4[%57, %c0_37, %c0_38], %60 {strides = array<i32>} : memref<8x2x128xf32, #tpu.memory_space<vmem>>, vector<1x2x128xf32>,
    }
    %c4_i32_2 = arith.constant 4 : i32
    return
  }
  func.func @transform_0(%arg0: i32, %arg1: i32) -> (i32, i32, i32) {
    %c0_i32 = arith.constant 0 : i32
    %c0_i32_0 = arith.constant 0 : i32
    return %arg1, %arg0, %c0_i32 : i32, i32, i32
  }
  func.func @transform_2(%arg0: i32, %arg1: i32) -> (i32, i32, i32) {
    %c0_i32 = arith.constant 0 : i32
    %c0_i32_0 = arith.constant 0 : i32
    return %arg1, %arg0, %c0_i32 : i32, i32, i32
  }
}

module attributes {stable_mosaic.version = 11 : i64} {
  func.func @_proj_kernel(%arg0: i32, %arg1: memref<16x128xf32, #tpu.memory_space<vmem>>, %arg2: memref<128x256xf32, #tpu.memory_space<vmem>>, %arg3: memref<16x256xf32, #tpu.memory_space<vmem>>) attributes {dimension_semantics = [#tpu.dimension_semantics<parallel>], iteration_bounds = array<i64: 1>, scalar_prefetch = 0 : i64, scratch_operands = 0 : i64, tpu.core_type = #tpu.core_type<tc>, window_params = [{transform_indices = @transform_0, window_bounds = array<i64: 16, 128>}, {pipeline_mode = #tpu.pipeline_mode<synchronous>, transform_indices = @transform_1, window_bounds = array<i64: 128, 256>}, {transform_indices = @transform_2, window_bounds = array<i64: 16, 256>}]} {
    %c0 = arith.constant 0 : index
    %c0_0 = arith.constant 0 : index
    %0 = vector.load %arg1[%c0, %c0_0] : memref<16x128xf32, #tpu.memory_space<vmem>>, vector<16x128xf32>
    %c0_1 = arith.constant 0 : index
    %c0_2 = arith.constant 0 : index
    %1 = vector.load %arg2[%c0_1, %c0_2] : memref<128x256xf32, #tpu.memory_space<vmem>>, vector<128x256xf32>
    %cst = arith.constant dense<0.000000e+00> : vector<16x256xf32>
    %2 = tpu.matmul %0, %1, %cst {dimension_numbers = #tpu.dot_dimension_numbers<[1], [0], [0], [1], [0, 0, 1, 1], [], []>} : vector<16x128xf32>, vector<128x256xf32>, vector<16x256xf32> -> vector<16x256xf32>
    %c0_3 = arith.constant 0 : index
    %c0_4 = arith.constant 0 : index
    %3 = vector.load %arg3[%c0_3, %c0_4] : memref<16x256xf32, #tpu.memory_space<vmem>>, vector<16x256xf32>
    tpu.vector_store %arg3[%c0_3, %c0_4], %2 {strides = array<i32>} : memref<16x256xf32, #tpu.memory_space<vmem>>, vector<16x256xf32>,
    return
  }
  func.func @transform_0(%arg0: i32) -> (i32, i32) {
    %c0_i32 = arith.constant 0 : i32
    %c0_i32_0 = arith.constant 0 : i32
    return %arg0, %c0_i32 : i32, i32
  }
  func.func @transform_1(%arg0: i32) -> (i32, i32) {
    %c0_i32 = arith.constant 0 : i32
    %c0_i32_0 = arith.constant 0 : i32
    %c0_i32_1 = arith.constant 0 : i32
    return %c0_i32, %c0_i32_0 : i32, i32
  }
  func.func @transform_2(%arg0: i32) -> (i32, i32) {
    %c0_i32 = arith.constant 0 : i32
    %c0_i32_0 = arith.constant 0 : i32
    return %arg0, %c0_i32 : i32, i32
  }
}

module attributes {stable_mosaic.version = 11 : i64} {
  func.func @_gsu_scan_kernel(%arg0: i32, %arg1: i32, %arg2: memref<8x2x256xf32, #tpu.memory_space<vmem>>, %arg3: memref<128x256xf32, #tpu.memory_space<any>>, %arg4: memref<8x2x128xf32, #tpu.memory_space<vmem>>, %arg5: memref<128x256xf32, #tpu.memory_space<vmem>>, %arg6: memref<2x128xf32, #tpu.memory_space<vmem>>, %arg7: memref<2x128xf32, #tpu.memory_space<vmem>>) attributes {dimension_semantics = [#tpu.dimension_semantics<parallel>, #tpu.dimension_semantics<arbitrary>], iteration_bounds = array<i64: 1, 1>, scalar_prefetch = 0 : i64, scratch_operands = 3 : i64, tpu.core_type = #tpu.core_type<tc>, window_params = [{transform_indices = @transform_0, window_bounds = array<i64: 8, 2, 256>}, {}, {transform_indices = @transform_2, window_bounds = array<i64: 8, 2, 128>}]} {
    %c0_i32 = arith.constant 0 : i32
    %0 = arith.cmpi eq, %arg1, %c0_i32 : i32
    %1 = arith.extui %0 : i1 to i32
    %c0_i32_0 = arith.constant 0 : i32
    %2 = arith.cmpi ne, %1, %c0_i32_0 : i32
    scf.if %2 {
      "tpu.region"() ({
        %8 = tpu.sem_alloc : memref<!tpu.dma_semaphore, #tpu.memory_space<semaphore_mem>>
        tpu.enqueue_dma source(%arg3 : memref<128x256xf32, #tpu.memory_space<any>>) target(%arg5 : memref<128x256xf32, #tpu.memory_space<vmem>>) target_semaphore(%8 : memref<!tpu.dma_semaphore, #tpu.memory_space<semaphore_mem>>)
        tpu.wait_dma2 semaphore(%8 : memref<!tpu.dma_semaphore, #tpu.memory_space<semaphore_mem>>) src(%arg3 : memref<128x256xf32, #tpu.memory_space<any>>) dst(%arg5 : memref<128x256xf32, #tpu.memory_space<vmem>>)
        tpu.yield
      }) : () -> ()
      %cst = arith.constant 0.000000e+00 : f32
      %4 = vector.broadcast %cst : f32 to vector<2x128xf32>
      %c0 = arith.constant 0 : index
      %c0_3 = arith.constant 0 : index
      %5 = vector.load %arg6[%c0, %c0_3] : memref<2x128xf32, #tpu.memory_space<vmem>>, vector<2x128xf32>
      tpu.vector_store %arg6[%c0, %c0_3], %4 {strides = array<i32>} : memref<2x128xf32, #tpu.memory_space<vmem>>, vector<2x128xf32>,
      %cst_4 = arith.constant 0.000000e+00 : f32
      %6 = vector.broadcast %cst_4 : f32 to vector<2x128xf32>
      %c0_5 = arith.constant 0 : index
      %c0_6 = arith.constant 0 : index
      %7 = vector.load %arg7[%c0_5, %c0_6] : memref<2x128xf32, #tpu.memory_space<vmem>>, vector<2x128xf32>
      tpu.vector_store %arg7[%c0_5, %c0_6], %6 {strides = array<i32>} : memref<2x128xf32, #tpu.memory_space<vmem>>, vector<2x128xf32>,
    } else {
    }
    %c0_i32_1 = arith.constant 0 : i32
    %c4_i32 = arith.constant 4 : i32
    %3 = arith.addi %c0_i32_1, %c4_i32 : i32
    %c1_i32 = arith.constant 1 : i32
    scf.for %arg8 = %c0_i32_1 to %3 step %c1_i32  : i32 {
      %c2_i32 = arith.constant 2 : i32
      %4 = arith.muli %arg8, %c2_i32 : i32
      %5 = arith.index_cast %4 : i32 to index
      %c0 = arith.constant 0 : index
      %c0_3 = arith.constant 0 : index
      %6 = vector.load %arg2[%5, %c0, %c0_3] : memref<8x2x256xf32, #tpu.memory_space<vmem>>, vector<1x2x256xf32>
      %7 = vector.shape_cast %6 : vector<1x2x256xf32> to vector<2x256xf32>
      %c0_4 = arith.constant 0 : index
      %c0_5 = arith.constant 0 : index
      %8 = vector.load %arg6[%c0_4, %c0_5] : memref<2x128xf32, #tpu.memory_space<vmem>>, vector<2x128xf32>
      %c0_6 = arith.constant 0 : index
      %c0_7 = arith.constant 0 : index
      %9 = vector.load %arg5[%c0_6, %c0_7] : memref<128x256xf32, #tpu.memory_space<vmem>>, vector<128x256xf32>
      %cst = arith.constant dense<0.000000e+00> : vector<2x256xf32>
      %10 = tpu.matmul %8, %9, %cst {dimension_numbers = #tpu.dot_dimension_numbers<[1], [0], [0], [1], [0, 0, 1, 1], [], []>} : vector<2x128xf32>, vector<128x256xf32>, vector<2x256xf32> -> vector<2x256xf32>
      %11 = arith.addf %7, %10 : vector<2x256xf32>
      %12 = vector.extract_strided_slice %11 {offsets = [0, 0], sizes = [2, 128], strides = [1, 1]} : vector<2x256xf32> to vector<2x128xf32>
      %13 = vector.extract_strided_slice %11 {offsets = [0, 128], sizes = [2, 128], strides = [1, 1]} : vector<2x256xf32> to vector<2x128xf32>
      %cst_8 = arith.constant 0.000000e+00 : f32
      %14 = vector.broadcast %cst_8 : f32 to vector<2x128xf32>
      %15 = arith.subf %14, %13 : vector<2x128xf32>
      %16 = math.exp %15 : vector<2x128xf32>
      %cst_9 = arith.constant 1.000000e+00 : f32
      %17 = vector.broadcast %cst_9 : f32 to vector<2x128xf32>
      %18 = arith.addf %17, %16 : vector<2x128xf32>
      %19 = tpu.reciprocal %18 {approx = true} : vector<2x128xf32> -> vector<2x128xf32>
      %c0_10 = arith.constant 0 : index
      %c0_11 = arith.constant 0 : index
      %20 = vector.load %arg7[%c0_10, %c0_11] : memref<2x128xf32, #tpu.memory_space<vmem>>, vector<2x128xf32>
      %21 = arith.subf %20, %12 : vector<2x128xf32>
      %22 = arith.mulf %19, %21 : vector<2x128xf32>
      %23 = arith.addf %12, %22 : vector<2x128xf32>
      %cst_12 = arith.constant 0.000000e+00 : f32
      %24 = vector.broadcast %cst_12 : f32 to vector<2x128xf32>
      %25 = arith.maximumf %23, %24 : vector<2x128xf32>
      %c0_13 = arith.constant 0 : index
      %c0_14 = arith.constant 0 : index
      %26 = vector.load %arg7[%c0_13, %c0_14] : memref<2x128xf32, #tpu.memory_space<vmem>>, vector<2x128xf32>
      tpu.vector_store %arg7[%c0_13, %c0_14], %23 {strides = array<i32>} : memref<2x128xf32, #tpu.memory_space<vmem>>, vector<2x128xf32>,
      %c0_15 = arith.constant 0 : index
      %c0_16 = arith.constant 0 : index
      %27 = vector.load %arg6[%c0_15, %c0_16] : memref<2x128xf32, #tpu.memory_space<vmem>>, vector<2x128xf32>
      tpu.vector_store %arg6[%c0_15, %c0_16], %25 {strides = array<i32>} : memref<2x128xf32, #tpu.memory_space<vmem>>, vector<2x128xf32>,
      %28 = arith.index_cast %4 : i32 to index
      %c0_17 = arith.constant 0 : index
      %c0_18 = arith.constant 0 : index
      %29 = vector.load %arg4[%28, %c0_17, %c0_18] : memref<8x2x128xf32, #tpu.memory_space<vmem>>, vector<1x2x128xf32>
      %30 = vector.shape_cast %29 : vector<1x2x128xf32> to vector<2x128xf32>
      %31 = vector.shape_cast %25 : vector<2x128xf32> to vector<1x2x128xf32>
      tpu.vector_store %arg4[%28, %c0_17, %c0_18], %31 {strides = array<i32>} : memref<8x2x128xf32, #tpu.memory_space<vmem>>, vector<1x2x128xf32>,
      %c2_i32_19 = arith.constant 2 : i32
      %32 = arith.muli %arg8, %c2_i32_19 : i32
      %c1_i32_20 = arith.constant 1 : i32
      %33 = arith.addi %32, %c1_i32_20 : i32
      %34 = arith.index_cast %33 : i32 to index
      %c0_21 = arith.constant 0 : index
      %c0_22 = arith.constant 0 : index
      %35 = vector.load %arg2[%34, %c0_21, %c0_22] : memref<8x2x256xf32, #tpu.memory_space<vmem>>, vector<1x2x256xf32>
      %36 = vector.shape_cast %35 : vector<1x2x256xf32> to vector<2x256xf32>
      %c0_23 = arith.constant 0 : index
      %c0_24 = arith.constant 0 : index
      %37 = vector.load %arg6[%c0_23, %c0_24] : memref<2x128xf32, #tpu.memory_space<vmem>>, vector<2x128xf32>
      %c0_25 = arith.constant 0 : index
      %c0_26 = arith.constant 0 : index
      %38 = vector.load %arg5[%c0_25, %c0_26] : memref<128x256xf32, #tpu.memory_space<vmem>>, vector<128x256xf32>
      %cst_27 = arith.constant dense<0.000000e+00> : vector<2x256xf32>
      %39 = tpu.matmul %37, %38, %cst_27 {dimension_numbers = #tpu.dot_dimension_numbers<[1], [0], [0], [1], [0, 0, 1, 1], [], []>} : vector<2x128xf32>, vector<128x256xf32>, vector<2x256xf32> -> vector<2x256xf32>
      %40 = arith.addf %36, %39 : vector<2x256xf32>
      %41 = vector.extract_strided_slice %40 {offsets = [0, 0], sizes = [2, 128], strides = [1, 1]} : vector<2x256xf32> to vector<2x128xf32>
      %42 = vector.extract_strided_slice %40 {offsets = [0, 128], sizes = [2, 128], strides = [1, 1]} : vector<2x256xf32> to vector<2x128xf32>
      %cst_28 = arith.constant 0.000000e+00 : f32
      %43 = vector.broadcast %cst_28 : f32 to vector<2x128xf32>
      %44 = arith.subf %43, %42 : vector<2x128xf32>
      %45 = math.exp %44 : vector<2x128xf32>
      %cst_29 = arith.constant 1.000000e+00 : f32
      %46 = vector.broadcast %cst_29 : f32 to vector<2x128xf32>
      %47 = arith.addf %46, %45 : vector<2x128xf32>
      %48 = tpu.reciprocal %47 {approx = true} : vector<2x128xf32> -> vector<2x128xf32>
      %c0_30 = arith.constant 0 : index
      %c0_31 = arith.constant 0 : index
      %49 = vector.load %arg7[%c0_30, %c0_31] : memref<2x128xf32, #tpu.memory_space<vmem>>, vector<2x128xf32>
      %50 = arith.subf %49, %41 : vector<2x128xf32>
      %51 = arith.mulf %48, %50 : vector<2x128xf32>
      %52 = arith.addf %41, %51 : vector<2x128xf32>
      %cst_32 = arith.constant 0.000000e+00 : f32
      %53 = vector.broadcast %cst_32 : f32 to vector<2x128xf32>
      %54 = arith.maximumf %52, %53 : vector<2x128xf32>
      %c0_33 = arith.constant 0 : index
      %c0_34 = arith.constant 0 : index
      %55 = vector.load %arg7[%c0_33, %c0_34] : memref<2x128xf32, #tpu.memory_space<vmem>>, vector<2x128xf32>
      tpu.vector_store %arg7[%c0_33, %c0_34], %52 {strides = array<i32>} : memref<2x128xf32, #tpu.memory_space<vmem>>, vector<2x128xf32>,
      %c0_35 = arith.constant 0 : index
      %c0_36 = arith.constant 0 : index
      %56 = vector.load %arg6[%c0_35, %c0_36] : memref<2x128xf32, #tpu.memory_space<vmem>>, vector<2x128xf32>
      tpu.vector_store %arg6[%c0_35, %c0_36], %54 {strides = array<i32>} : memref<2x128xf32, #tpu.memory_space<vmem>>, vector<2x128xf32>,
      %57 = arith.index_cast %33 : i32 to index
      %c0_37 = arith.constant 0 : index
      %c0_38 = arith.constant 0 : index
      %58 = vector.load %arg4[%57, %c0_37, %c0_38] : memref<8x2x128xf32, #tpu.memory_space<vmem>>, vector<1x2x128xf32>
      %59 = vector.shape_cast %58 : vector<1x2x128xf32> to vector<2x128xf32>
      %60 = vector.shape_cast %54 : vector<2x128xf32> to vector<1x2x128xf32>
      tpu.vector_store %arg4[%57, %c0_37, %c0_38], %60 {strides = array<i32>} : memref<8x2x128xf32, #tpu.memory_space<vmem>>, vector<1x2x128xf32>,
    }
    %c4_i32_2 = arith.constant 4 : i32
    return
  }
  func.func @transform_0(%arg0: i32, %arg1: i32) -> (i32, i32, i32) {
    %c0_i32 = arith.constant 0 : i32
    %c0_i32_0 = arith.constant 0 : i32
    return %arg1, %arg0, %c0_i32 : i32, i32, i32
  }
  func.func @transform_2(%arg0: i32, %arg1: i32) -> (i32, i32, i32) {
    %c0_i32 = arith.constant 0 : i32
    %c0_i32_0 = arith.constant 0 : i32
    return %arg1, %arg0, %c0_i32 : i32, i32, i32
  }
}

</mosaic_0001>

<bundles_post_ra>
// kernel: sequence_model_forward.4
= control target key start
LH: loop header
LB: loop body
LE: loop exit
PB: predicated region body
PF: predicated region fallthrough
CT: control target
= control target key end

     0   :  { %9 = vsyncpa [#allocation3], 0  ;;  %s213_s15 = smov [#allocation2]   ;;  %s275_s0 = inlined_call_operand.vmem [shape: f32[16,16], index: 0, kind: input, shape index: {}]   ;;  %s276_s1 = inlined_call_operand.vmem [shape: f32[1,16], index: 1, kind: input, shape index: {}]   ;;  %s277_s2 = inlined_call_operand.vmem [shape: f32[1,16], index: 2, kind: input, shape index: {}]   ;;  %s278_s3 = inlined_call_operand.hbm [shape: f32[16,256], index: 3, kind: input, shape index: {}]   ;;  %s279_s4 = inlined_call_operand.vmem [shape: f32[16,256], index: 4, kind: output, shape index: {}]  }
   0x1   :  { %s21_s16 = sshll.u32 %s213_s15, 4  ;;  %s22_s16 = int_to_ptr.vmem [resolvable:$true] %s21_s16 }
   0x2   :  { %s199_s17 = scalar_lea.vmem %s22_s16, 512  ;;  %p204_p1 = scmp.lt.s32.totalorder %s22_s16, %s22_s16 }
   0x3   :  { %p200_p0 = scmp.ne.s32.totalorder %s22_s16, %s199_s17  ;;  %p205_p2 = scmp.lt.s32.totalorder %s199_s17, %s199_s17 }
   0x5   :  { %p206_p3 = por %p205_p2, %p204_p1 }
   0x7   :  { %p207_p4 = pnand %p206_p3, %p200_p0 }
   0x9   :  { %210 = shalt.err (!%p207_p4)
}
   0xa   :  { %s214_s18 = smov 256   ;;  %s215_s19 = smov 16  }
   0xb   :  { %27 = dma.hbm_to_vmem [thread:$0]  %s278_s3, 512, %s22_s16, [#allocation3], %s214_s18, %s214_s18, %s215_s19  }
   0xc   :  { %211 = dma.done.wait [#allocation3], 512  }
   0xd   :  { %212 = vsyncadd [#allocation3], 4294966784  ;;  %vm33_vm0 = vcmask 130048   ;;  %v31_v0 = vld [vmem:[%s275_s0] sm:$0xff]  ;;  %v32_v1 = vld [vmem:[%s275_s0 + $0x8] sm:$0xff]  ;;  %v216_v18 = vmov 0.0  }
   0xe   :  { %v34_v2 = vsel %vm33_vm0, %v31_v0, 0.0  ;;  %v37_v3 = vsel %vm33_vm0, %v32_v1, 0.0  ;;  %v82_v14 = vld [vmem:[#allocation2 + $0x18] sm:$0xff]  ;;  %v81_v15 = vld [vmem:[#allocation2 + $0x10] sm:$0xff]  ;;  %v80_v16 = vld [vmem:[#allocation2 + $0x8] sm:$0xff]  ;;  %153 = vmatprep.mubr.f32.mxu0 %v216_v18  ;;  %159 = vmatprep.mubr.f32.mxu1 %v216_v18 }
   0xf   :  { %35 = vadd.xlane.f32.xlu0 %v34_v2  ;;  %117 = vmatprep.subr.mxu0 %v82_v14  ;;  %v79_v17 = vld [vmem:[#allocation2] sm:$0xff] }
  0x10   :  { %118 = vmatpush1.msra.mxu0 %v81_v15  ;;  %179 = vmatprep.subr.mxu1 %v82_v14  ;;  %v175_v26 = vld [vmem:[%s276_s1] ss:$0 sm:$0xff] }
  0x11   :  { %119 = vmatprep.subr.mxu0 %v80_v16  ;;  %181 = vmatpush1.msra.mxu1 %v81_v15  ;;  %v176_v28 = vld [vmem:[%s277_s2] ss:$0 sm:$0xff] }
  0x12   :  { %120 = vmatpush1.msra.mxu0 %v79_v17  ;;  %180 = vmatprep.subr.mxu1 %v80_v16 }
  0x13   :  { %38 = vadd.xlane.f32.xlu0 %v37_v3  ;;  %182 = vmatpush1.msra.mxu1 %v79_v17 }
  0x98   :  { %v36_v4 = vpop.xlane.xlu0 %35 }
  0x99   :  { %v41_v5 = vmul.f32 0.0625, %v36_v4 }
  0x9b   :  { %v43_v6 = vsub.f32 %v31_v0, %v41_v5 }
  0x9c   :  { %v39_v7 = vpop.xlane.xlu0 %38 }
  0x9d   :  { %v42_v8 = vmul.f32 0.0625, %v39_v7  ;;  %v45_v9 = vmul.f32 %v43_v6, %v43_v6 }
  0x9f   :  { %v44_v10 = vsub.f32 %v32_v1, %v42_v8  ;;  %v47_v11 = vsel %vm33_vm0, %v45_v9, 0.0 }
  0xa0   :  { %48 = vadd.xlane.f32.xlu1 %v47_v11 }
  0xa1   :  { %v46_v12 = vmul.f32 %v44_v10, %v44_v10 }
  0xa3   :  { %v50_v13 = vsel %vm33_vm0, %v46_v12, 0.0 }
  0xa4   :  { %51 = vadd.xlane.f32.xlu1 %v50_v13 }
 0x129   :  { %v49_v19 = vpop.xlane.xlu1 %48 }
 0x12a   :  { %v53_v20 = vmul.f32 0.0625, %v49_v19 }
 0x12c   :  { %v55_v21 = vadd.f32 1e-05, %v53_v20 }
 0x12d   :  { %v52_v22 = vpop.xlane.xlu1 %51 }
 0x12e   :  { %187 = vrsqrt.f32 %v55_v21  ;;  %v54_v23 = vmul.f32 0.0625, %v52_v22 }
 0x130   :  { %v56_v24 = vadd.f32 1e-05, %v54_v23 }
 0x132   :  { %189 = vrsqrt.f32 %v56_v24 }
 0x13b   :  { %v188_v25 = vpop.eup %187 }
 0x13c   :  { %v59_v27 = vmul.f32 %v188_v25, %v43_v6 }
 0x13e   :  { %v68_v29 = vmul.f32 %v175_v26, %v59_v27 }
 0x13f   :  { %v190_v30 = vpop.eup %189 }
 0x140   :  { %v77_v31 = vadd.f32 %v176_v28, %v68_v29  ;;  %v60_v32 = vmul.f32 %v190_v30, %v44_v10 }
 0x142   :  { %177 = vmatmul.mubr.msk.f32.vlgmr.msra.gmra.mxu0 %vm33_vm0, %v77_v31  ;;  %v69_v33 = vmul.f32 %v175_v26, %v60_v32 }
 0x144   :  { %v78_v34 = vadd.f32 %v176_v28, %v69_v33 }
 0x146   :  { %178 = vmatmul.mubr.msk.f32.vlgmr.msra.gmra.mxu1 %vm33_vm0, %v78_v34 }
 0x202   :  { %v155_v35 = vpop.f32.mrf.mxu0 }
 0x203   :  { %166 = vst [vmem:[%s279_s4] sm:$0xff] %v155_v35 }
 0x204   :  { %v157_v36 = vpop.f32.mrf.mxu0 }
 0x205   :  { %167 = vst [vmem:[%s279_s4 + $0x8] sm:$0xff] %v157_v36 }
 0x206   :  { %v161_v37 = vpop.f32.mrf.mxu1 }
 0x207   :  { %168 = vst [vmem:[%s279_s4 + $0x10] sm:$0xff] %v161_v37 }
 0x208   :  { %v163_v38 = vpop.f32.mrf.mxu1 }
 0x209   :  { %169 = vst [vmem:[%s279_s4 + $0x18] sm:$0xff] %v163_v38 }
 0x20a   :  { %174 = vsyncpa [#allocation3], 1 }

// kernel: sequence_model_forward.6
= control target key start
LH: loop header
LB: loop body
LE: loop exit
PB: predicated region body
PF: predicated region fallthrough
CT: control target
= control target key end

     0   :  { %v163_v3 = vmov 0.0   ;;  %s293_s1 = inlined_call_operand.vmem [shape: f32[128,256], index: 1, kind: input, shape index: {}]   ;;  %s294_s0 = inlined_call_operand.vmem [shape: f32[16,128], index: 0, kind: input, shape index: {}]   ;;  %s295_s2 = inlined_call_operand.vmem [shape: f32[16,256], index: 2, kind: output, shape index: {}]  }
   0x1   :  { %v44_v0 = vld [vmem:[%s293_s1 + $0xf8] sm:$0xff]  ;;  %v43_v1 = vld [vmem:[%s293_s1 + $0xf0] sm:$0xff]  ;;  %v42_v2 = vld [vmem:[%s293_s1 + $0xe8] sm:$0xff]  ;;  %109 = vmatprep.mubr.f32.mxu0 %v163_v3  ;;  %115 = vmatprep.mubr.f32.mxu1 %v163_v3 }
   0x2   :  { %45 = vmatprep.subr.mxu0 %v44_v0  ;;  %130 = vmatprep.subr.mxu1 %v44_v0  ;;  %v41_v4 = vld [vmem:[%s293_s1 + $0xe0] sm:$0xff]  ;;  %v40_v5 = vld [vmem:[%s293_s1 + $0xd8] sm:$0xff]  ;;  %v39_v6 = vld [vmem:[%s293_s1 + $0xd0] sm:$0xff] }
   0x3   :  { %46 = vmatpush1.msra.mxu0 %v43_v1  ;;  %146 = vmatpush1.msra.mxu1 %v43_v1  ;;  %v38_v7 = vld [vmem:[%s293_s1 + $0xc8] sm:$0xff]  ;;  %v37_v8 = vld [vmem:[%s293_s1 + $0xc0] sm:$0xff]  ;;  %v36_v9 = vld [vmem:[%s293_s1 + $0xb8] sm:$0xff] }
   0x4   :  { %47 = vmatprep.subr.mxu0 %v42_v2  ;;  %131 = vmatprep.subr.mxu1 %v42_v2  ;;  %v35_v10 = vld [vmem:[%s293_s1 + $0xb0] sm:$0xff]  ;;  %v34_v11 = vld [vmem:[%s293_s1 + $0xa8] sm:$0xff]  ;;  %v33_v12 = vld [vmem:[%s293_s1 + $0xa0] sm:$0xff] }
   0x5   :  { %48 = vmatpush1.msra.mxu0 %v41_v4  ;;  %147 = vmatpush1.msra.mxu1 %v41_v4  ;;  %v32_v13 = vld [vmem:[%s293_s1 + $0x98] sm:$0xff]  ;;  %v31_v14 = vld [vmem:[%s293_s1 + $0x90] sm:$0xff]  ;;  %v30_v15 = vld [vmem:[%s293_s1 + $0x88] sm:$0xff] }
   0x6   :  { %49 = vmatprep.subr.mxu0 %v40_v5  ;;  %132 = vmatprep.subr.mxu1 %v40_v5  ;;  %v29_v16 = vld [vmem:[%s293_s1 + $0x80] sm:$0xff]  ;;  %v28_v17 = vld [vmem:[%s293_s1 + $0x78] sm:$0xff]  ;;  %v27_v18 = vld [vmem:[%s293_s1 + $0x70] sm:$0xff] }
   0x7   :  { %50 = vmatpush1.msra.mxu0 %v39_v6  ;;  %148 = vmatpush1.msra.mxu1 %v39_v6  ;;  %v26_v19 = vld [vmem:[%s293_s1 + $0x68] sm:$0xff]  ;;  %v25_v20 = vld [vmem:[%s293_s1 + $0x60] sm:$0xff]  ;;  %v24_v21 = vld [vmem:[%s293_s1 + $0x58] sm:$0xff] }
   0x8   :  { %51 = vmatprep.subr.mxu0 %v38_v7  ;;  %133 = vmatprep.subr.mxu1 %v38_v7  ;;  %v23_v22 = vld [vmem:[%s293_s1 + $0x50] sm:$0xff]  ;;  %v22_v23 = vld [vmem:[%s293_s1 + $0x48] sm:$0xff]  ;;  %v21_v24 = vld [vmem:[%s293_s1 + $0x40] sm:$0xff] }
   0x9   :  { %52 = vmatpush1.msra.mxu0 %v37_v8  ;;  %149 = vmatpush1.msra.mxu1 %v37_v8  ;;  %v20_v25 = vld [vmem:[%s293_s1 + $0x38] sm:$0xff]  ;;  %v19_v26 = vld [vmem:[%s293_s1 + $0x30] sm:$0xff]  ;;  %v18_v27 = vld [vmem:[%s293_s1 + $0x28] sm:$0xff] }
   0xa   :  { %53 = vmatprep.subr.mxu0 %v36_v9  ;;  %134 = vmatprep.subr.mxu1 %v36_v9  ;;  %v17_v28 = vld [vmem:[%s293_s1 + $0x20] sm:$0xff]  ;;  %v16_v29 = vld [vmem:[%s293_s1 + $0x18] sm:$0xff]  ;;  %v15_v30 = vld [vmem:[%s293_s1 + $0x10] sm:$0xff] }
   0xb   :  { %54 = vmatpush1.msra.mxu0 %v35_v10  ;;  %150 = vmatpush1.msra.mxu1 %v35_v10  ;;  %v14_v31 = vld [vmem:[%s293_s1 + $0x8] sm:$0xff]  ;;  %v13_v32 = vld [vmem:[%s293_s1] sm:$0xff] }
   0xc   :  { %55 = vmatprep.subr.mxu0 %v34_v11  ;;  %135 = vmatprep.subr.mxu1 %v34_v11  ;;  %v11_v33 = vld [vmem:[%s294_s0] sm:$0xff]  ;;  %v12_v34 = vld [vmem:[%s294_s0 + $0x8] sm:$0xff] }
   0xd   :  { %56 = vmatpush1.msra.mxu0 %v33_v12  ;;  %151 = vmatpush1.msra.mxu1 %v33_v12 }
   0xe   :  { %57 = vmatprep.subr.mxu0 %v32_v13  ;;  %136 = vmatprep.subr.mxu1 %v32_v13 }
   0xf   :  { %58 = vmatpush1.msra.mxu0 %v31_v14  ;;  %152 = vmatpush1.msra.mxu1 %v31_v14 }
  0x10   :  { %59 = vmatprep.subr.mxu0 %v30_v15  ;;  %137 = vmatprep.subr.mxu1 %v30_v15 }
  0x11   :  { %60 = vmatpush1.msra.mxu0 %v29_v16  ;;  %153 = vmatpush1.msra.mxu1 %v29_v16 }
  0x12   :  { %61 = vmatprep.subr.mxu0 %v28_v17  ;;  %138 = vmatprep.subr.mxu1 %v28_v17 }
  0x13   :  { %62 = vmatpush1.msra.mxu0 %v27_v18  ;;  %154 = vmatpush1.msra.mxu1 %v27_v18 }
  0x14   :  { %63 = vmatprep.subr.mxu0 %v26_v19  ;;  %139 = vmatprep.subr.mxu1 %v26_v19 }
  0x15   :  { %64 = vmatpush1.msra.mxu0 %v25_v20  ;;  %155 = vmatpush1.msra.mxu1 %v25_v20 }
  0x16   :  { %65 = vmatprep.subr.mxu0 %v24_v21  ;;  %140 = vmatprep.subr.mxu1 %v24_v21 }
  0x17   :  { %66 = vmatpush1.msra.mxu0 %v23_v22  ;;  %156 = vmatpush1.msra.mxu1 %v23_v22 }
  0x18   :  { %67 = vmatprep.subr.mxu0 %v22_v23  ;;  %141 = vmatprep.subr.mxu1 %v22_v23 }
  0x19   :  { %68 = vmatpush1.msra.mxu0 %v21_v24  ;;  %157 = vmatpush1.msra.mxu1 %v21_v24 }
  0x1a   :  { %69 = vmatprep.subr.mxu0 %v20_v25  ;;  %142 = vmatprep.subr.mxu1 %v20_v25 }
  0x1b   :  { %70 = vmatpush1.msra.mxu0 %v19_v26  ;;  %158 = vmatpush1.msra.mxu1 %v19_v26 }
  0x1c   :  { %71 = vmatprep.subr.mxu0 %v18_v27  ;;  %143 = vmatprep.subr.mxu1 %v18_v27 }
  0x1d   :  { %72 = vmatpush1.msra.mxu0 %v17_v28  ;;  %159 = vmatpush1.msra.mxu1 %v17_v28 }
  0x1e   :  { %73 = vmatprep.subr.mxu0 %v16_v29  ;;  %144 = vmatprep.subr.mxu1 %v16_v29 }
  0x1f   :  { %74 = vmatpush1.msra.mxu0 %v15_v30  ;;  %160 = vmatpush1.msra.mxu1 %v15_v30 }
  0x20   :  { %75 = vmatprep.subr.mxu0 %v14_v31  ;;  %145 = vmatprep.subr.mxu1 %v14_v31 }
  0x21   :  { %76 = vmatpush1.msra.mxu0 %v13_v32  ;;  %161 = vmatpush1.msra.mxu1 %v13_v32 }
  0x22   :  { %110 = vmatmul.mubr.f32.vlgmr.msra.gmra.mxu0 %v11_v33  ;;  %116 = vmatmul.mubr.f32.vlgmr.msra.gmra.mxu1 %v12_v34 }
  0xe2   :  { %v111_v35 = vpop.f32.mrf.mxu0  ;;  %v117_v36 = vpop.f32.mrf.mxu1 }
  0xe3   :  { %122 = vst [vmem:[%s295_s2] sm:$0xff] %v111_v35  ;;  %124 = vst [vmem:[%s295_s2 + $0x10] sm:$0xff] %v117_v36 }
  0xe4   :  { %v113_v37 = vpop.f32.mrf.mxu0  ;;  %v119_v38 = vpop.f32.mrf.mxu1 }
  0xe5   :  { %123 = vst [vmem:[%s295_s2 + $0x8] sm:$0xff] %v113_v37  ;;  %125 = vst [vmem:[%s295_s2 + $0x18] sm:$0xff] %v119_v38 }

// kernel: sequence_model_forward.5
= control target key start
LH: loop header
LB: loop body
LE: loop exit
PB: predicated region body
PF: predicated region fallthrough
CT: control target
= control target key end

     0   :  { %s396_s9 = smov [#allocation2]   ;;  %s436_s0 = inlined_call_operand.vmem [shape: f32[8,2,256], index: 0, kind: input, shape index: {}]   ;;  %s437_s1 = inlined_call_operand.hbm [shape: f32[128,256], index: 1, kind: input, shape index: {}]   ;;  %s438_s2 = inlined_call_operand.vmem [shape: f32[8,2,128], index: 2, kind: output, shape index: {}]  }
   0x1   :  { %s20_s10 = sshll.u32 %s396_s9, 4  ;;  %s21_s10 = int_to_ptr.vmem [resolvable:$true] %s20_s10 }
   0x2   :  { %s374_s11 = scalar_lea.vmem %s21_s10, 4096  ;;  %p379_p1 = scmp.lt.s32.totalorder %s21_s10, %s21_s10 }
   0x3   :  { %p375_p0 = scmp.ne.s32.totalorder %s21_s10, %s374_s11  ;;  %p380_p2 = scmp.lt.s32.totalorder %s374_s11, %s374_s11 }
   0x5   :  { %p381_p3 = por %p380_p2, %p379_p1 }
   0x7   :  { %p382_p4 = pnand %p381_p3, %p375_p0 }
   0x9   :  { %385 = shalt.err (!%p382_p4)  }
   0xa   :  { %23 = dma.hbm_to_vmem [thread:$0]  %s437_s1, 4096, %s21_s10, [#allocation5] }
   0xb   :  { %390 = dma.done.wait [#allocation5], 4096 }
   0xc   :  { %391 = vsyncadd [#allocation5], 4294963200  ;;  %v397_v0 = vmov 0.0   ;;  %s418_s14 = smov 0  }
   0xd   :  { %28 = vst [vmem:[#allocation3] sm:$0x3] %v397_v0  ;;  %29 = vst [vmem:[#allocation4] sm:$0x3] %v397_v0 }
   0xe LB: > { %v73_v1 = vld [vmem:[#allocation2 + $0xf8] sm:$0xff]  ;;  %v72_v2 = vld [vmem:[#allocation2 + $0xf0] sm:$0xff]  ;;  %v71_v3 = vld [vmem:[#allocation2 + $0xe8] sm:$0xff]  ;;  %v398_v5 = vmov 0.0   ;;  %v399_v35 = vmov 1983009808   ;;  %v151_v37 = vlaneseq  ;;  %s394_s14 = sphi %s418_s14, %s35_s14  }
   0xf   : > { %74 = vmatprep.subr.mxu0 %v73_v1  ;;  %v70_v4 = vld [vmem:[#allocation2 + $0xe0] sm:$0xff]  ;;  %138 = vmatprep.mubr.f32.mxu0 %v398_v5  ;;  %v69_v6 = vld [vmem:[#allocation2 + $0xd8] sm:$0xff]  ;;  %v68_v7 = vld [vmem:[#allocation2 + $0xd0] sm:$0xff]  ;;  %v149_v36 = vunpack.c.l.s4 %v399_v35  ;;  %s343_s1 = sshll.u32 %s394_s14, 3  ;;  %s342_s18 = sshll.u32 %s394_s14, 2 }
  0x10   : > { %75 = vmatpush1.msra.mxu0 %v72_v2  ;;  %212 = vmatprep.subr.mxu1 %v73_v1  ;;  %v67_v8 = vld [vmem:[#allocation2 + $0xc8] sm:$0xff]  ;;  %v66_v9 = vld [vmem:[#allocation2 + $0xc0] sm:$0xff]  ;;  %v65_v10 = vld [vmem:[#allocation2 + $0xb8] sm:$0xff]  ;;  %v152_v39 = vshrl.u32 %v151_v37, 7  ;;  %s39_s17 = scalar_lea.vmem %s436_s0, %s343_s1  ;;  %s172_s21 = scalar_lea.vmem %s438_s2, %s342_s18 }
  0x11   : > { %76 = vmatprep.subr.mxu0 %v71_v3  ;;  %213 = vmatpush1.msra.mxu1 %v72_v2  ;;  %v64_v11 = vld [vmem:[#allocation2 + $0xb0] sm:$0xff]  ;;  %v63_v12 = vld [vmem:[#allocation2 + $0xa8] sm:$0xff]  ;;  %v62_v13 = vld [vmem:[#allocation2 + $0xa0] sm:$0xff]  ;;  %v150_v38 = vunpack.c.0.s8 %v149_v36  ;;  %s35_s14 = sadd.s32 1, %s394_s14  }
  0x12   : > { %77 = vmatpush1.msra.mxu0 %v70_v4  ;;  %214 = vmatprep.subr.mxu1 %v71_v3  ;;  %v61_v14 = vld [vmem:[#allocation2 + $0x98] sm:$0xff]  ;;  %v60_v15 = vld [vmem:[#allocation2 + $0x90] sm:$0xff]  ;;  %v59_v16 = vld [vmem:[#allocation2 + $0x88] sm:$0xff]  ;;  %p32_p5 = scmp.ge.s32.totalorder %s35_s14, 4  }
  0x13   : > { %78 = vmatprep.subr.mxu0 %v69_v6  ;;  %215 = vmatpush1.msra.mxu1 %v70_v4  ;;  %v58_v17 = vld [vmem:[#allocation2 + $0x80] sm:$0xff]  ;;  %v57_v18 = vld [vmem:[#allocation2 + $0x78] sm:$0xff]  ;;  %v56_v19 = vld [vmem:[#allocation2 + $0x70] sm:$0xff]  ;;  %v153_v41 = vsub.s32 %v150_v38, %v152_v39 }
  0x14   : > { %79 = vmatpush1.msra.mxu0 %v68_v7  ;;  %216 = vmatprep.subr.mxu1 %v69_v6  ;;  %v55_v20 = vld [vmem:[#allocation2 + $0x68] sm:$0xff]  ;;  %v54_v21 = vld [vmem:[#allocation2 + $0x60] sm:$0xff]  ;;  %v53_v22 = vld [vmem:[#allocation2 + $0x58] sm:$0xff] }
  0x15   : > { %80 = vmatprep.subr.mxu0 %v67_v8  ;;  %217 = vmatpush1.msra.mxu1 %v68_v7  ;;  %v52_v23 = vld [vmem:[#allocation2 + $0x50] sm:$0xff]  ;;  %v51_v24 = vld [vmem:[#allocation2 + $0x48] sm:$0xff]  ;;  %v50_v25 = vld [vmem:[#allocation2 + $0x40] sm:$0xff] }
  0x16   : > { %81 = vmatpush1.msra.mxu0 %v66_v9  ;;  %218 = vmatprep.subr.mxu1 %v67_v8  ;;  %v49_v26 = vld [vmem:[#allocation2 + $0x38] sm:$0xff]  ;;  %v48_v27 = vld [vmem:[#allocation2 + $0x30] sm:$0xff]  ;;  %v47_v28 = vld [vmem:[#allocation2 + $0x28] sm:$0xff] }
  0x17   : > { %82 = vmatprep.subr.mxu0 %v65_v10  ;;  %219 = vmatpush1.msra.mxu1 %v66_v9  ;;  %v46_v29 = vld [vmem:[#allocation2 + $0x20] sm:$0xff]  ;;  %v45_v30 = vld [vmem:[#allocation2 + $0x18] sm:$0xff]  ;;  %v44_v31 = vld [vmem:[#allocation2 + $0x10] sm:$0xff] }
  0x18   : > { %83 = vmatpush1.msra.mxu0 %v64_v11  ;;  %220 = vmatprep.subr.mxu1 %v65_v10  ;;  %v43_v32 = vld [vmem:[#allocation2 + $0x8] sm:$0xff]  ;;  %v42_v33 = vld [vmem:[#allocation2] sm:$0xff] }
  0x19   : > { %84 = vmatprep.subr.mxu0 %v63_v12  ;;  %221 = vmatpush1.msra.mxu1 %v64_v11  ;;  %v41_v34 = vld [vmem:[#allocation3] sm:$0x3]  ;;  %v165_v52 = vld [vmem:[#allocation4] sm:$0x3]  ;;  %v338_v62 = vld [vmem:[%s39_s17 + $0x4] sm:$0xf] }
  0x1a   : > { %85 = vmatpush1.msra.mxu0 %v62_v13  ;;  %222 = vmatprep.subr.mxu1 %v63_v12  ;;  %v40_v44 = vld [vmem:[%s39_s17] sm:$0xf] }
  0x1b   : > { %86 = vmatprep.subr.mxu0 %v61_v14  ;;  %223 = vmatpush1.msra.mxu1 %v62_v13 }
  0x1c   : > { %87 = vmatpush1.msra.mxu0 %v60_v15  ;;  %224 = vmatprep.subr.mxu1 %v61_v14 }
  0x1d   : > { %88 = vmatprep.subr.mxu0 %v59_v16  ;;  %225 = vmatpush1.msra.mxu1 %v60_v15 }
  0x1e   : > { %89 = vmatpush1.msra.mxu0 %v58_v17  ;;  %226 = vmatprep.subr.mxu1 %v59_v16 }
  0x1f   : > { %90 = vmatprep.subr.mxu0 %v57_v18  ;;  %227 = vmatpush1.msra.mxu1 %v58_v17 }
  0x20   : > { %91 = vmatpush1.msra.mxu0 %v56_v19  ;;  %228 = vmatprep.subr.mxu1 %v57_v18 }
  0x21   : > { %92 = vmatprep.subr.mxu0 %v55_v20  ;;  %229 = vmatpush1.msra.mxu1 %v56_v19 }
  0x22   : > { %93 = vmatpush1.msra.mxu0 %v54_v21  ;;  %230 = vmatprep.subr.mxu1 %v55_v20 }
  0x23   : > { %94 = vmatprep.subr.mxu0 %v53_v22  ;;  %231 = vmatpush1.msra.mxu1 %v54_v21 }
  0x24   : > { %95 = vmatpush1.msra.mxu0 %v52_v23  ;;  %232 = vmatprep.subr.mxu1 %v53_v22 }
  0x25   : > { %96 = vmatprep.subr.mxu0 %v51_v24  ;;  %233 = vmatpush1.msra.mxu1 %v52_v23 }
  0x26   : > { %97 = vmatpush1.msra.mxu0 %v50_v25  ;;  %234 = vmatprep.subr.mxu1 %v51_v24 }
  0x27   : > { %98 = vmatprep.subr.mxu0 %v49_v26  ;;  %235 = vmatpush1.msra.mxu1 %v50_v25 }
  0x28   : > { %99 = vmatpush1.msra.mxu0 %v48_v27  ;;  %236 = vmatprep.subr.mxu1 %v49_v26 }
  0x29   : > { %100 = vmatprep.subr.mxu0 %v47_v28  ;;  %237 = vmatpush1.msra.mxu1 %v48_v27 }
  0x2a   : > { %101 = vmatpush1.msra.mxu0 %v46_v29  ;;  %238 = vmatprep.subr.mxu1 %v47_v28 }
  0x2b   : > { %102 = vmatprep.subr.mxu0 %v45_v30  ;;  %239 = vmatpush1.msra.mxu1 %v46_v29 }
  0x2c   : > { %103 = vmatpush1.msra.mxu0 %v44_v31  ;;  %240 = vmatprep.subr.mxu1 %v45_v30 }
  0x2d   : > { %104 = vmatprep.subr.mxu0 %v43_v32  ;;  %241 = vmatpush1.msra.mxu1 %v44_v31 }
  0x2e   : > { %105 = vmatpush1.msra.mxu0 %v42_v33  ;;  %242 = vmatprep.subr.mxu1 %v43_v32 }
  0x2f   : > { %139 = vmatmul.mubr.f32.vlgmr.msra.gmra.mxu0 %v41_v34  ;;  %243 = vmatpush1.msra.mxu1 %v42_v33 }
  0x30   : > { %276 = vmatprep.mubr.f32.mxu1 %v398_v5 }
  0xef   : > { %v140_v40 = vpop.f32.mrf.mxu0 }
  0xf1   : > { %v142_v42 = vpop.f32.mrf.mxu0 }
  0xf2   : > { %v147_v43 = vcombine.low %v140_v40, %v142_v42 }
  0xf4   : > { %v154_v45 = vrot.slane %v147_v43, %v153_v41 }
  0xf6   : > { %v156_v46 = vadd.f32 %v154_v45, %v40_v44 }
  0xf8   : > { %v158_v47 = vrot.slane %v156_v46, 2  ;;  %v166_v53 = vsub.f32 %v165_v52, %v156_v46 }
  0xfa   : > { %v160_v48 = vsub.f32 0.0, %v158_v47 }
  0xfc   : > { %v161_v49 = vmul.f32 1.442695, %v160_v48 }
  0xfe   : > { %358 = vpow2.f32 %v161_v49 }
 0x10b   : > { %v359_v50 = vpop.eup %358 }
 0x10c   : > { %v163_v51 = vadd.f32 1.0, %v359_v50 }
 0x10e   : > { %360 = vrcp.f32 %v163_v51 }
 0x11b   : > { %v361_v54 = vpop.eup %360 }
 0x11c   : > { %v167_v55 = vmul.f32 %v361_v54, %v166_v53 }
 0x11e   : > { %v168_v56 = vadd.f32 %v167_v55, %v156_v46 }
 0x120   : > { %v169_v57 = vmax.f32 %v168_v56, 0.0  ;;  %170 = vst [vmem:[#allocation4] sm:$0x3] %v168_v56 }
 0x122   : > { %171 = vst [vmem:[#allocation3] sm:$0x3] %v169_v57  ;;  %173 = vst [vmem:[%s172_s21] sm:$0x3] %v169_v57 }
 0x127   : > { %v303_v6 = vld [vmem:[#allocation4] sm:$0x3] }
 0x129   : > { %v179_v58 = vld [vmem:[#allocation3] sm:$0x3] }
 0x12a   : > { %277 = vmatmul.mubr.f32.vlgmr.msra.gmra.mxu1 %v179_v58 }
 0x1ea   : > { %v278_v59 = vpop.f32.mrf.mxu1 }
 0x1ec   : > { %v280_v60 = vpop.f32.mrf.mxu1 }
 0x1ed   : > { %v285_v61 = vcombine.low %v278_v59, %v280_v60 }
 0x1ef   : > { %v292_v63 = vrot.slane %v285_v61, %v153_v41 }
 0x1f1   : > { %v294_v0 = vadd.f32 %v338_v62, %v292_v63 }
 0x1f3   : > { %v296_v1 = vrot.slane %v294_v0, 2  ;;  %v304_v7 = vsub.f32 %v303_v6, %v294_v0 }
 0x1f5   : > { %v298_v2 = vsub.f32 0.0, %v296_v1 }
 0x1f7   : > { %v299_v3 = vmul.f32 1.442695, %v298_v2 }
 0x1f9   : > { %362 = vpow2.f32 %v299_v3 }
 0x206   : > { %v363_v4 = vpop.eup %362 }
 0x207   : > { %v301_v5 = vadd.f32 1.0, %v363_v4 }
 0x209   : > { %364 = vrcp.f32 %v301_v5 }
 0x216   : > { %v365_v8 = vpop.eup %364 }
 0x217   : > { %v305_v9 = vmul.f32 %v365_v8, %v304_v7 }
 0x219   : > { %v306_v10 = vadd.f32 %v305_v9, %v294_v0  ;;  %34 = sbr.rel (!%p32_p5) target bundleno = 14 (0xe), region = 44 }
 0x21b   : > { %v307_v11 = vmax.f32 %v306_v10, 0.0  ;;  %308 = vst [vmem:[#allocation4] sm:$0x3] %v306_v10 }
 0x21d   : > { %309 = vst [vmem:[#allocation3] sm:$0x3] %v307_v11  ;;  %341 = vst [vmem:[%s172_s21 + $0x2] sm:$0x3] %v307_v11 }

// kernel: sequence_model_forward.7
= control target key start
LH: loop header
LB: loop body
LE: loop exit
PB: predicated region body
PF: predicated region fallthrough
CT: control target
= control target key end

     0   :  { %s609_s0 = inlined_call_operand.vmem [shape: f32[8,2,256], index: 0, kind: input, shape index: {}]   ;;  %s610_s1 = inlined_call_operand.vmem [shape: f32[128,256], index: 1, kind: input, shape index: {}]   ;;  %s611_s2 = inlined_call_operand.vmem [shape: f32[8,2,128], index: 2, kind: output, shape index: {}]  }
   0x1   :  { %v46_v0 = vld [vmem:[%s610_s1] sm:$0xff]  ;;  %v48_v1 = vld [vmem:[%s610_s1 + $0x8] sm:$0xff]  ;;  %v50_v2 = vld [vmem:[%s610_s1 + $0x10] sm:$0xff] }
   0x2   :  { %47 = vst [vmem:[#allocation2 + $0xb0] sm:$0xff] %v46_v0  ;;  %49 = vst [vmem:[#allocation2] sm:$0xff] %v48_v1  ;;  %v52_v3 = vld [vmem:[%s610_s1 + $0x18] sm:$0xff]  ;;  %v54_v4 = vld [vmem:[%s610_s1 + $0x20] sm:$0xff] }
   0x3   :  { %51 = vst [vmem:[#allocation2 + $0xd8] sm:$0xff] %v50_v2  ;;  %v56_v5 = vld [vmem:[%s610_s1 + $0x28] sm:$0xff]  ;;  %53 = vst [vmem:[#allocation2 + $0x18] sm:$0xff] %v52_v3  ;;  %v58_v6 = vld [vmem:[%s610_s1 + $0x30] sm:$0xff] }
   0x4   :  { %55 = vst [vmem:[#allocation2 + $0x50] sm:$0xff] %v54_v4  ;;  %57 = vst [vmem:[#allocation2 + $0x68] sm:$0xff] %v56_v5  ;;  %v60_v7 = vld [vmem:[%s610_s1 + $0x38] sm:$0xff]  ;;  %v62_v8 = vld [vmem:[%s610_s1 + $0x40] sm:$0xff] }
   0x5   :  { %59 = vst [vmem:[#allocation2 + $0x30] sm:$0xff] %v58_v6  ;;  %61 = vst [vmem:[#allocation2 + $0x48] sm:$0xff] %v60_v7  ;;  %v64_v9 = vld [vmem:[%s610_s1 + $0x48] sm:$0xff]  ;;  %v66_v10 = vld [vmem:[%s610_s1 + $0x50] sm:$0xff] }
   0x6   :  { %63 = vst [vmem:[#allocation2 + $0x80] sm:$0xff] %v62_v8  ;;  %v68_v11 = vld [vmem:[%s610_s1 + $0x58] sm:$0xff]  ;;  %65 = vst [vmem:[#allocation2 + $0x88] sm:$0xff] %v64_v9  ;;  %v70_v12 = vld [vmem:[%s610_s1 + $0x60] sm:$0xff] }
   0x7   :  { %67 = vst [vmem:[#allocation2 + $0xe8] sm:$0xff] %v66_v10  ;;  %69 = vst [vmem:[#allocation2 + $0xb8] sm:$0xff] %v68_v11  ;;  %v72_v13 = vld [vmem:[%s610_s1 + $0x68] sm:$0xff]  ;;  %v74_v14 = vld [vmem:[%s610_s1 + $0x70] sm:$0xff] }
   0x8   :  { %71 = vst [vmem:[#allocation2 + $0x60] sm:$0xff] %v70_v12  ;;  %73 = vst [vmem:[#allocation2 + $0xf0] sm:$0xff] %v72_v13  ;;  %v76_v15 = vld [vmem:[%s610_s1 + $0x78] sm:$0xff]  ;;  %v78_v16 = vld [vmem:[%s610_s1 + $0x80] sm:$0xff] }
   0x9   :  { %75 = vst [vmem:[#allocation2 + $0x8] sm:$0xff] %v74_v14  ;;  %v80_v17 = vld [vmem:[%s610_s1 + $0x88] sm:$0xff]  ;;  %77 = vst [vmem:[#allocation2 + $0x78] sm:$0xff] %v76_v15  ;;  %v82_v18 = vld [vmem:[%s610_s1 + $0x90] sm:$0xff] }
   0xa   :  { %79 = vst [vmem:[#allocation2 + $0x38] sm:$0xff] %v78_v16  ;;  %81 = vst [vmem:[#allocation2 + $0x58] sm:$0xff] %v80_v17  ;;  %v84_v19 = vld [vmem:[%s610_s1 + $0x98] sm:$0xff]  ;;  %v86_v20 = vld [vmem:[%s610_s1 + $0xa0] sm:$0xff] }
   0xb   :  { %83 = vst [vmem:[#allocation2 + $0x40] sm:$0xff] %v82_v18  ;;  %85 = vst [vmem:[#allocation2 + $0xc8] sm:$0xff] %v84_v19  ;;  %v88_v21 = vld [vmem:[%s610_s1 + $0xa8] sm:$0xff]  ;;  %v90_v22 = vld [vmem:[%s610_s1 + $0xb0] sm:$0xff] }
   0xc   :  { %87 = vst [vmem:[#allocation2 + $0xe0] sm:$0xff] %v86_v20  ;;  %v92_v23 = vld [vmem:[%s610_s1 + $0xb8] sm:$0xff]  ;;  %89 = vst [vmem:[#allocation2 + $0x90] sm:$0xff] %v88_v21  ;;  %v94_v24 = vld [vmem:[%s610_s1 + $0xc0] sm:$0xff] }
   0xd   :  { %91 = vst [vmem:[#allocation2 + $0x70] sm:$0xff] %v90_v22  ;;  %93 = vst [vmem:[#allocation2 + $0xc0] sm:$0xff] %v92_v23  ;;  %v96_v25 = vld [vmem:[%s610_s1 + $0xc8] sm:$0xff]  ;;  %v98_v26 = vld [vmem:[%s610_s1 + $0xd0] sm:$0xff] }
   0xe   :  { %95 = vst [vmem:[#allocation2 + $0xa8] sm:$0xff] %v94_v24  ;;  %97 = vst [vmem:[#allocation2 + $0xd0] sm:$0xff] %v96_v25  ;;  %v100_v27 = vld [vmem:[%s610_s1 + $0xd8] sm:$0xff]  ;;  %v102_v28 = vld [vmem:[%s610_s1 + $0xe0] sm:$0xff] }
   0xf   :  { %99 = vst [vmem:[#allocation2 + $0x10] sm:$0xff] %v98_v26  ;;  %v104_v29 = vld [vmem:[%s610_s1 + $0xe8] sm:$0xff]  ;;  %101 = vst [vmem:[#allocation2 + $0x28] sm:$0xff] %v100_v27  ;;  %v106_v30 = vld [vmem:[%s610_s1 + $0xf0] sm:$0xff] }
  0x10   :  { %103 = vst [vmem:[#allocation2 + $0xa0] sm:$0xff] %v102_v28  ;;  %105 = vst [vmem:[#allocation2 + $0xf8] sm:$0xff] %v104_v29  ;;  %v108_v31 = vld [vmem:[%s610_s1 + $0xf8] sm:$0xff] }
  0x11   :  { %107 = vst [vmem:[#allocation2 + $0x20] sm:$0xff] %v106_v30  ;;  %109 = vst [vmem:[#allocation2 + $0x98] sm:$0xff] %v108_v31 }
  0x12   :  { %117 = vsyncadd [#allocation5], 4096 }
  0x13   :  { %471 = dma.done.wait [#allocation5], 4096 }
  0x14   :  { %472 = vsyncadd [#allocation5], 4294963200  ;;  %v477_v32 = vmov 0.0   ;;  %s591_s17 = smov 0  }
  0x15   :  { %122 = vst [vmem:[#allocation3] sm:$0x3] %v477_v32  ;;  %123 = vst [vmem:[#allocation4] sm:$0x3] %v477_v32 }
  0x16 LB: > { %v478_v37 = vmov 0.0   ;;  %v163_v38 = vld [vmem:[#allocation2 + $0x28] sm:$0xff]  ;;  %v162_v39 = vld [vmem:[#allocation2 + $0x10] sm:$0xff]  ;;  %v159_v42 = vld [vmem:[#allocation2 + $0xc0] sm:$0xff]  ;;  %v479_v3 = vmov 1983009808   ;;  %v245_v5 = vlaneseq  ;;  %s475_s17 = sphi %s591_s17, %s129_s17  }
  0x17   : > { %v165_v35 = vld [vmem:[#allocation2 + $0xf8] sm:$0xff]  ;;  %v164_v36 = vld [vmem:[#allocation2 + $0xa0] sm:$0xff]  ;;  %232 = vmatprep.mubr.f32.mxu0 %v478_v37  ;;  %v161_v40 = vld [vmem:[#allocation2 + $0xd0] sm:$0xff]  ;;  %370 = vmatprep.mubr.f32.mxu1 %v478_v37  ;;  %v243_v4 = vunpack.c.l.s4 %v479_v3  ;;  %s445_s1 = sshll.u32 %s475_s17, 3  ;;  %s444_s21 = sshll.u32 %s475_s17, 2 }
  0x18   : > { %v167_v33 = vld [vmem:[#allocation2 + $0x98] sm:$0xff]  ;;  %v166_v34 = vld [vmem:[#allocation2 + $0x20] sm:$0xff]  ;;  %v160_v41 = vld [vmem:[#allocation2 + $0xa8] sm:$0xff]  ;;  %v246_v7 = vshrl.u32 %v245_v5, 7  ;;  %s133_s20 = scalar_lea.vmem %s609_s0, %s445_s1  ;;  %s266_s24 = scalar_lea.vmem %s611_s2, %s444_s21 }
  0x19   : > { %168 = vmatprep.subr.mxu0 %v167_v33  ;;  %306 = vmatprep.subr.mxu1 %v167_v33  ;;  %v158_v43 = vld [vmem:[#allocation2 + $0x70] sm:$0xff]  ;;  %v156_v45 = vld [vmem:[#allocation2 + $0xe0] sm:$0xff]  ;;  %v155_v46 = vld [vmem:[#allocation2 + $0xc8] sm:$0xff]  ;;  %v244_v6 = vunpack.c.0.s8 %v243_v4  ;;  %s129_s17 = sadd.s32 1, %s475_s17  }
  0x1a   : > { %169 = vmatpush1.msra.mxu0 %v166_v34  ;;  %307 = vmatpush1.msra.mxu1 %v166_v34  ;;  %v157_v44 = vld [vmem:[#allocation2 + $0x90] sm:$0xff]  ;;  %v154_v47 = vld [vmem:[#allocation2 + $0x40] sm:$0xff]  ;;  %v153_v48 = vld [vmem:[#allocation2 + $0x58] sm:$0xff]  ;;  %p126_p0 = scmp.ge.s32.totalorder %s129_s17, 4  }
  0x1b   : > { %170 = vmatprep.subr.mxu0 %v165_v35  ;;  %308 = vmatprep.subr.mxu1 %v165_v35  ;;  %v152_v49 = vld [vmem:[#allocation2 + $0x38] sm:$0xff]  ;;  %v150_v51 = vld [vmem:[#allocation2 + $0x8] sm:$0xff]  ;;  %v149_v52 = vld [vmem:[#allocation2 + $0xf0] sm:$0xff]  ;;  %v247_v9 = vsub.s32 %v244_v6, %v246_v7 }
  0x1c   : > { %171 = vmatpush1.msra.mxu0 %v164_v36  ;;  %309 = vmatpush1.msra.mxu1 %v164_v36  ;;  %v151_v50 = vld [vmem:[#allocation2 + $0x78] sm:$0xff]  ;;  %v148_v53 = vld [vmem:[#allocation2 + $0x60] sm:$0xff]  ;;  %v146_v55 = vld [vmem:[#allocation2 + $0xe8] sm:$0xff] }
  0x1d   : > { %172 = vmatprep.subr.mxu0 %v163_v38  ;;  %310 = vmatprep.subr.mxu1 %v163_v38  ;;  %v147_v54 = vld [vmem:[#allocation2 + $0xb8] sm:$0xff]  ;;  %v145_v56 = vld [vmem:[#allocation2 + $0x88] sm:$0xff]  ;;  %v144_v57 = vld [vmem:[#allocation2 + $0x80] sm:$0xff] }
  0x1e   : > { %173 = vmatpush1.msra.mxu0 %v162_v39  ;;  %311 = vmatpush1.msra.mxu1 %v162_v39  ;;  %v143_v58 = vld [vmem:[#allocation2 + $0x48] sm:$0xff]  ;;  %v142_v59 = vld [vmem:[#allocation2 + $0x30] sm:$0xff]  ;;  %v139_v62 = vld [vmem:[#allocation2 + $0x18] sm:$0xff] }
  0x1f   : > { %174 = vmatprep.subr.mxu0 %v161_v40  ;;  %312 = vmatprep.subr.mxu1 %v161_v40  ;;  %v141_v60 = vld [vmem:[#allocation2 + $0x68] sm:$0xff]  ;;  %v140_v61 = vld [vmem:[#allocation2 + $0x50] sm:$0xff]  ;;  %v138_v63 = vld [vmem:[#allocation2 + $0xd8] sm:$0xff] }
  0x20   : > { %175 = vmatpush1.msra.mxu0 %v160_v41  ;;  %313 = vmatpush1.msra.mxu1 %v160_v41  ;;  %v137_v0 = vld [vmem:[#allocation2] sm:$0xff]  ;;  %v136_v1 = vld [vmem:[#allocation2 + $0xb0] sm:$0xff] }
  0x21   : > { %176 = vmatprep.subr.mxu0 %v159_v42  ;;  %314 = vmatprep.subr.mxu1 %v159_v42  ;;  %v135_v2 = vld [vmem:[#allocation3] sm:$0x3]  ;;  %v259_v20 = vld [vmem:[#allocation4] sm:$0x3]  ;;  %v440_v30 = vld [vmem:[%s133_s20 + $0x4] sm:$0xf] }
  0x22   : > { %177 = vmatpush1.msra.mxu0 %v158_v43  ;;  %315 = vmatpush1.msra.mxu1 %v158_v43  ;;  %v134_v12 = vld [vmem:[%s133_s20] sm:$0xf] }
  0x23   : > { %178 = vmatprep.subr.mxu0 %v157_v44  ;;  %316 = vmatprep.subr.mxu1 %v157_v44 }
  0x24   : > { %179 = vmatpush1.msra.mxu0 %v156_v45  ;;  %317 = vmatpush1.msra.mxu1 %v156_v45 }
  0x25   : > { %180 = vmatprep.subr.mxu0 %v155_v46  ;;  %318 = vmatprep.subr.mxu1 %v155_v46 }
  0x26   : > { %181 = vmatpush1.msra.mxu0 %v154_v47  ;;  %319 = vmatpush1.msra.mxu1 %v154_v47 }
  0x27   : > { %182 = vmatprep.subr.mxu0 %v153_v48  ;;  %320 = vmatprep.subr.mxu1 %v153_v48 }
  0x28   : > { %183 = vmatpush1.msra.mxu0 %v152_v49  ;;  %321 = vmatpush1.msra.mxu1 %v152_v49 }
  0x29   : > { %184 = vmatprep.subr.mxu0 %v151_v50  ;;  %322 = vmatprep.subr.mxu1 %v151_v50 }
  0x2a   : > { %185 = vmatpush1.msra.mxu0 %v150_v51  ;;  %323 = vmatpush1.msra.mxu1 %v150_v51 }
  0x2b   : > { %186 = vmatprep.subr.mxu0 %v149_v52  ;;  %324 = vmatprep.subr.mxu1 %v149_v52 }
  0x2c   : > { %187 = vmatpush1.msra.mxu0 %v148_v53  ;;  %325 = vmatpush1.msra.mxu1 %v148_v53 }
  0x2d   : > { %188 = vmatprep.subr.mxu0 %v147_v54  ;;  %326 = vmatprep.subr.mxu1 %v147_v54 }
  0x2e   : > { %189 = vmatpush1.msra.mxu0 %v146_v55  ;;  %327 = vmatpush1.msra.mxu1 %v146_v55 }
  0x2f   : > { %190 = vmatprep.subr.mxu0 %v145_v56  ;;  %328 = vmatprep.subr.mxu1 %v145_v56 }
  0x30   : > { %191 = vmatpush1.msra.mxu0 %v144_v57  ;;  %329 = vmatpush1.msra.mxu1 %v144_v57 }
  0x31   : > { %192 = vmatprep.subr.mxu0 %v143_v58  ;;  %330 = vmatprep.subr.mxu1 %v143_v58 }
  0x32   : > { %193 = vmatpush1.msra.mxu0 %v142_v59  ;;  %331 = vmatpush1.msra.mxu1 %v142_v59 }
  0x33   : > { %194 = vmatprep.subr.mxu0 %v141_v60  ;;  %332 = vmatprep.subr.mxu1 %v141_v60 }
  0x34   : > { %195 = vmatpush1.msra.mxu0 %v140_v61  ;;  %333 = vmatpush1.msra.mxu1 %v140_v61 }
  0x35   : > { %196 = vmatprep.subr.mxu0 %v139_v62  ;;  %334 = vmatprep.subr.mxu1 %v139_v62 }
  0x36   : > { %197 = vmatpush1.msra.mxu0 %v138_v63  ;;  %335 = vmatpush1.msra.mxu1 %v138_v63 }
  0x37   : > { %198 = vmatprep.subr.mxu0 %v137_v0  ;;  %336 = vmatprep.subr.mxu1 %v137_v0 }
  0x38   : > { %199 = vmatpush1.msra.mxu0 %v136_v1  ;;  %337 = vmatpush1.msra.mxu1 %v136_v1 }
  0x39   : > { %233 = vmatmul.mubr.f32.vlgmr.msra.gmra.mxu0 %v135_v2 }
  0xf9   : > { %v234_v8 = vpop.f32.mrf.mxu0 }
  0xfb   : > { %v236_v10 = vpop.f32.mrf.mxu0 }
  0xfc   : > { %v241_v11 = vcombine.low %v234_v8, %v236_v10 }
  0xfe   : > { %v248_v13 = vrot.slane %v241_v11, %v247_v9 }
 0x100   : > { %v250_v14 = vadd.f32 %v248_v13, %v134_v12 }
 0x102   : > { %v252_v15 = vrot.slane %v250_v14, 2  ;;  %v260_v21 = vsub.f32 %v259_v20, %v250_v14 }
 0x104   : > { %v254_v16 = vsub.f32 0.0, %v252_v15 }
 0x106   : > { %v255_v17 = vmul.f32 1.442695, %v254_v16 }
 0x108   : > { %459 = vpow2.f32 %v255_v17 }
 0x115   : > { %v460_v18 = vpop.eup %459 }
 0x116   : > { %v257_v19 = vadd.f32 1.0, %v460_v18 }
 0x118   : > { %461 = vrcp.f32 %v257_v19 }
 0x125   : > { %v462_v22 = vpop.eup %461 }
 0x126   : > { %v261_v23 = vmul.f32 %v462_v22, %v260_v21 }
 0x128   : > { %v262_v24 = vadd.f32 %v261_v23, %v250_v14 }
 0x12a   : > { %v263_v25 = vmax.f32 %v262_v24, 0.0  ;;  %264 = vst [vmem:[#allocation4] sm:$0x3] %v262_v24 }
 0x12c   : > { %265 = vst [vmem:[#allocation3] sm:$0x3] %v263_v25  ;;  %267 = vst [vmem:[%s266_s24] sm:$0x3] %v263_v25 }
 0x131   : > { %v397_v38 = vld [vmem:[#allocation4] sm:$0x3] }
 0x133   : > { %v273_v26 = vld [vmem:[#allocation3] sm:$0x3] }
 0x134   : > { %371 = vmatmul.mubr.f32.vlgmr.msra.gmra.mxu1 %v273_v26 }
 0x1f4   : > { %v372_v27 = vpop.f32.mrf.mxu1 }
 0x1f6   : > { %v374_v28 = vpop.f32.mrf.mxu1 }
 0x1f7   : > { %v379_v29 = vcombine.low %v372_v27, %v374_v28 }
 0x1f9   : > { %v386_v31 = vrot.slane %v379_v29, %v247_v9 }
 0x1fb   : > { %v388_v32 = vadd.f32 %v440_v30, %v386_v31 }
 0x1fd   : > { %v390_v33 = vrot.slane %v388_v32, 2  ;;  %v398_v39 = vsub.f32 %v397_v38, %v388_v32 }
 0x1ff   : > { %v392_v34 = vsub.f32 0.0, %v390_v33 }
 0x201   : > { %v393_v35 = vmul.f32 1.442695, %v392_v34 }
 0x203   : > { %463 = vpow2.f32 %v393_v35 }
 0x210   : > { %v464_v36 = vpop.eup %463 }
 0x211   : > { %v395_v37 = vadd.f32 1.0, %v464_v36 }
 0x213   : > { %465 = vrcp.f32 %v395_v37 }
 0x220   : > { %v466_v40 = vpop.eup %465 }
 0x221   : > { %v399_v41 = vmul.f32 %v466_v40, %v398_v39 }
 0x223   : > { %v400_v42 = vadd.f32 %v399_v41, %v388_v32  ;;  %128 = sbr.rel (!%p126_p0) target bundleno = 22 (0x16), region = 82 }
 0x225   : > { %v401_v43 = vmax.f32 %v400_v42, 0.0  ;;  %402 = vst [vmem:[#allocation4] sm:$0x3] %v400_v42 }
 0x227   : > { %403 = vst [vmem:[#allocation3] sm:$0x3] %v401_v43  ;;  %443 = vst [vmem:[%s266_s24 + $0x2] sm:$0x3] %v401_v43 }

</bundles_post_ra>
